<compile_context>
chip_gen: v6e
topology: v6e:2x2x1
jax: 0.10.0
libtpu: 0.0.40
codegen_flags: <defaults>
</compile_context>

<pallas_src>
import functools

import jax
import jax.numpy as jnp
import numpy as np
from jax import lax
from jax.experimental import pallas as pl
from jax.experimental.pallas import tpu as pltpu

Vth = 1.0
ALPHA_INIT_GRU = 0.9


def _round_up(v, m):
    return (v + m - 1) // m * m


def _spike_binary(p):
    # SpikeAct.forward: torch.ge(x, Vth).float()
    return (p >= Vth).astype(jnp.float32)


def _spike_signed(p):
    # SpikeAct_signed.forward: clamp(sign(x+Vth)+sign(x-Vth), -1, 1)
    return jnp.clip(jnp.sign(p + Vth) + jnp.sign(p - Vth), -1.0, 1.0)


# --------------------------------------------------------------------------
# Pallas kernel: one GRUlayer, time-major rows (row = recurrence_step*Bp + b).
# --------------------------------------------------------------------------
def _gru_layer_kernel(*refs, tt, nbatch, hid, ann, ternact, nstreams, revs,
                      compute_dtype):
    # refs layout:
    #   x streams (nstreams)  : (rows, Di) time blocks (rows = tt * Bp)
    #   w parts   (nstreams)  : (Di_pad, 2H) fused [Wz^T | Wi^T] per stream
    #   uT                    : (H, 2H)      fused [Uz^T | Ui^T]
    #   bias                  : (1, 2H)      [bz | bi + bui]
    #   alpha                 : (1, H)
    #   o_ref                 : (rows, H)    outputs for this time block
    #   h/tmp/cur scratch     : (Bp, H) f32  state carried across time blocks
    #   g scratch (nstreams)  : (rows, 2H) f32 staged input projections
    idx = 0
    x_refs = refs[idx:idx + nstreams]; idx += nstreams
    w_refs = refs[idx:idx + nstreams]; idx += nstreams
    u_ref = refs[idx]; idx += 1
    b_ref = refs[idx]; idx += 1
    alpha_ref = refs[idx]; idx += 1
    o_ref = refs[idx]; idx += 1
    h_ref, tmp_ref, cur_ref = refs[idx:idx + 3]; idx += 3
    g_refs = refs[idx:idx + nstreams]

    B, H = nbatch, hid
    cd = compute_dtype

    # State init only on the first time block; scratch persists across the
    # "arbitrary" time-block axis.
    @pl.when(pl.program_id(0) == 0)
    def _init():
        h_ref[...] = jnp.zeros_like(h_ref)
        tmp_ref[...] = jnp.zeros_like(tmp_ref)
        cur_ref[...] = jnp.zeros_like(cur_ref)

    # Fused [z|i] input projections for the whole block: one MXU matmul per
    # input stream, staged in VMEM scratch (bias folded into stream 0).
    g_refs[0][...] = (
        jnp.dot(x_refs[0][...].astype(cd), w_refs[0][...],
                preferred_element_type=jnp.float32) + b_ref[...])
    for s in range(1, nstreams):
        g_refs[s][...] = jnp.dot(x_refs[s][...].astype(cd), w_refs[s][...],
                                 preferred_element_type=jnp.float32)

    spike_fn = _spike_signed if ternact else _spike_binary

    # Register-carried state across the static within-block unroll.
    h = h_ref[...]
    tmp = tmp_ref[...]
    cur = cur_ref[...] if not ann else None
    alpha = alpha_ref[...] if not ann else None

    for t in range(tt):
        # One fused recurrent matmul per step: h @ [Uz^T | Ui^T].
        zi = jnp.dot(h.astype(cd), u_ref[...], preferred_element_type=jnp.float32)
        for s in range(nstreams):
            # Reversed streams are read back-to-front inside the block.
            r = ((tt - 1 - t) if revs[s] else t) * B
            zi = zi + g_refs[s][pl.ds(r, B), :]
        z = jax.nn.sigmoid(zi[:, 0:H])
        a = zi[:, H:2 * H]
        if ann:
            cur_t = jnp.tanh(a)
            tmp = z * tmp + (1.0 - z) * cur_t
            h = tmp
        else:
            cur = alpha * cur + a
            tmp = z * tmp + (1.0 - z) * cur - Vth * h
            h = spike_fn(tmp)
        o_ref[pl.ds(t * B, B), :] = h.astype(o_ref.dtype)

    h_ref[...] = h
    tmp_ref[...] = tmp
    if not ann:
        cur_ref[...] = cur


# --------------------------------------------------------------------------
# Host-side helpers: weight fusion/padding, block-size choice, one layer call.
# --------------------------------------------------------------------------
def _prep_layer(p, in_splits, *, Hp, compute_dtype, ann):
    """Fuse z/i weights, pad hidden to Hp. in_splits: per-stream (row0, rows, rows_padded)."""
    H = p["uzT"].shape[0]

    def fuse_cols(az, ai):  # (r, H), (r, H) -> (r, 2*Hp), [z | pad | i | pad]
        r = az.shape[0]
        out = jnp.zeros((r, 2 * Hp), jnp.float32)
        out = out.at[:, :H].set(az.astype(jnp.float32))
        out = out.at[:, Hp:Hp + H].set(ai.astype(jnp.float32))
        return out

    w_parts = []
    for r0, rl, rp in in_splits:
        fused = fuse_cols(p["wzT"][r0:r0 + rl], p["wiT"][r0:r0 + rl])
        if rp != rl:
            fused = jnp.pad(fused, ((0, rp - rl), (0, 0)))
        w_parts.append(fused.astype(compute_dtype))

    uT = fuse_cols(p["uzT"], p["uiT"])
    if Hp != H:
        uT = jnp.pad(uT, ((0, Hp - H), (0, 0)))
    uT = uT.astype(compute_dtype)

    bias = jnp.zeros((1, 2 * Hp), jnp.float32)
    bias = bias.at[0, :H].set(p["bz"]).at[0, Hp:Hp + H].set(p["bi"] + p["bui"])

    alpha = jnp.zeros((1, Hp), jnp.float32)
    if (not ann) and ("alpha" in p):
        # GRUlayer.clamp(): alpha is clamped to [0, 1] in the PyTorch module.
        alpha = alpha.at[0, :H].set(jnp.clip(p["alpha"], 0.0, 1.0))

    return dict(w_parts=w_parts, uT=uT, bias=bias, alpha=alpha)


def _pick_block_t(T, Bp, target_rows, max_rows):
    """Largest divisor of T such that bt*Bp stays <= max_rows, stopping once
    rows reaches target_rows (MXU M-dim fill / per-step overhead amortization)."""
    best = 1
    for d in range(1, T + 1):
        if T % d:
            continue
        if d * Bp <= max_rows:
            best = d
        if d * Bp >= target_rows:
            break
    return best


def _gru_layer(prep, streams, *, T, Bp, Hp, ann, ternact, compute_dtype,
               out_dtype, target_rows, max_rows=1024):
    """One GRUlayer forward. streams: list of (2D array (T*Bp, Di), reverse_flag)."""
    nstreams = len(streams)
    bt = _pick_block_t(T, Bp, target_rows, max_rows)
    rows = bt * Bp
    nb = T // bt

    in_specs = []
    args = []
    for arr, rev in streams:
        Di = arr.shape[1]
        if rev:
            # Opposite-direction stream: read blocks back-to-front (no
            # materialized flip/concat between layers).
            in_specs.append(pl.BlockSpec((rows, Di), lambda tb, _n=nb: (_n - 1 - tb, 0)))
        else:
            in_specs.append(pl.BlockSpec((rows, Di), lambda tb: (tb, 0)))
        args.append(arr)

    const = lambda tb: (0, 0)  # weights/bias: same block -> no re-DMA per step
    for w in prep["w_parts"]:
        in_specs.append(pl.BlockSpec(tuple(w.shape), const))
        args.append(w)
    in_specs.append(pl.BlockSpec(tuple(prep["uT"].shape), const)); args.append(prep["uT"])
    in_specs.append(pl.BlockSpec((1, 2 * Hp), const)); args.append(prep["bias"])
    in_specs.append(pl.BlockSpec((1, Hp), const)); args.append(prep["alpha"])

    scratch = ([pltpu.VMEM((Bp, Hp), jnp.float32) for _ in range(3)]      # h, tmp, cur
               + [pltpu.VMEM((rows, 2 * Hp), jnp.float32) for _ in range(nstreams)])

    # Explicit VMEM budget (double-buffered blocks + weights + scratch) with
    # headroom, clamped so it stays valid on v7x (64 MiB physical VMEM).
    wb = jnp.dtype(compute_dtype).itemsize
    est = 0
    for arr, _ in streams:
        est += 2 * rows * arr.shape[1] * arr.dtype.itemsize
    for w in prep["w_parts"]:
        est += 2 * w.size * wb
    est += 2 * prep["uT"].size * wb
    est += 2 * rows * Hp * jnp.dtype(out_dtype).itemsize
    est += 3 * Bp * Hp * 4 + nstreams * rows * 2 * Hp * 4
    vmem_limit = int(min(max(2 * est, 32 * 1024 * 1024), 64 * 1024 * 1024))

    kernel = functools.partial(
        _gru_layer_kernel, tt=bt, nbatch=Bp, hid=Hp, ann=ann, ternact=ternact,
        nstreams=nstreams, revs=tuple(bool(r) for _, r in streams),
        compute_dtype=compute_dtype)

    out = pl.pallas_call(
        kernel,
        out_shape=jax.ShapeDtypeStruct((T * Bp, Hp), out_dtype),
        grid_spec=pltpu.PrefetchScalarGridSpec(
            num_scalar_prefetch=0,
            grid=(nb,),
            in_specs=in_specs,
            out_specs=pl.BlockSpec((rows, Hp), lambda tb: (tb, 0)),
            scratch_shapes=scratch,
        ),
        compiler_params=pltpu.CompilerParams(
            # Time-block axis carries state in scratch -> execute in order.
            dimension_semantics=("arbitrary",),
            vmem_limit_bytes=vmem_limit,
        ),
    )(*args)
    return out


# --------------------------------------------------------------------------
# LiGRU forward (3 layers, optional bidirectional), built from the layer kernel.
# --------------------------------------------------------------------------
def ligru_forward(x, params, *, bidirectional, ann=False, ternact=False,
                  compute_dtype=jnp.float32, target_rows=256):
    """x: (B, T, D). Returns (out3, out2, out1), each (B, T, H) or (B, T, 2H), f32."""
    B, T, D = x.shape
    H = params["l1"]["uzT"].shape[0]
    Bp = _round_up(B, 8)      # sublane-dense rows (never the bt=T fallback)
    Hp = _round_up(H, 128)    # lane-dense hidden (padded lanes stay exactly 0)
    out_dtype = jnp.float32 if ann else jnp.bfloat16   # spikes are exact in bf16

    x_tm = jnp.transpose(x, (1, 0, 2))                 # single layout change at entry
    if Bp != B:
        x_tm = jnp.pad(x_tm, ((0, 0), (0, Bp - B), (0, 0)))
    x2d = x_tm.reshape(T * Bp, D)                      # row = recurrence_step*Bp + b

    run = functools.partial(_gru_layer, T=T, Bp=Bp, Hp=Hp, ann=ann, ternact=ternact,
                            compute_dtype=compute_dtype, out_dtype=out_dtype,
                            target_rows=target_rows)
    prep = functools.partial(_prep_layer, Hp=Hp, compute_dtype=compute_dtype, ann=ann)

    def finish(o):            # (T*Bp, Hp) -> (B, T, H) float32
        o = o.reshape(T, Bp, Hp)[:, :B, :H]
        return jnp.transpose(o, (1, 0, 2)).astype(jnp.float32)

    # TODO(synk): nn.Dropout between layers is identity here (eval mode).
    if bidirectional:
        p1 = prep(params["l1"], in_splits=[(0, D, D)])
        p1b = prep(params["l1b"], in_splits=[(0, D, D)])
        o1 = run(p1, [(x2d, False)])
        o1b = run(p1b, [(x2d, True)])      # backward layer reads x reversed (no flip copy)

        def bi_pair(pf, pb, a_fwd, a_bwd):
            # forward dir: input = cat(a_fwd, flip(a_bwd)); weight rows [0:H]->a_fwd
            pfp = prep(pf, in_splits=[(0, H, Hp), (H, H, Hp)])
            of = run(pfp, [(a_fwd, False), (a_bwd, True)])
            # backward dir: input = cat(flip(a_fwd), a_bwd); weight rows [H:2H]->a_bwd
            pbp = prep(pb, in_splits=[(H, H, Hp), (0, H, Hp)])
            ob = run(pbp, [(a_bwd, False), (a_fwd, True)])
            return of, ob

        o2, o2b = bi_pair(params["l2"], params["l2b"], o1, o1b)
        o3, o3b = bi_pair(params["l3"], params["l3b"], o2, o2b)
        cat = lambda a, b: jnp.concatenate([finish(a), finish(b)], axis=-1)
        # PyTorch returns the *_b outputs un-flipped (their own time order).
        return cat(o3, o3b), cat(o2, o2b), cat(o1, o1b)
    else:
        p1 = prep(params["l1"], in_splits=[(0, D, D)])
        p2 = prep(params["l2"], in_splits=[(0, H, Hp)])
        p3 = prep(params["l3"], in_splits=[(0, H, Hp)])
        o1 = run(p1, [(x2d, False)])
        o2 = run(p2, [(o1, False)])
        o3 = run(p3, [(o2, False)])
        return finish(o3), finish(o2), finish(o1)


# --------------------------------------------------------------------------
# Pure-JAX reference mirroring the PyTorch forward (for validation).
# --------------------------------------------------------------------------
def _gru_layer_ref(x, p, *, ann=False, ternact=False):
    B, T, _ = x.shape
    H = p["uzT"].shape[0]
    hp = lax.Precision.HIGHEST
    spike_fn = _spike_signed if ternact else _spike_binary
    bic = p["bi"] + p["bui"]
    alpha = jnp.clip(p["alpha"], 0.0, 1.0) if ("alpha" in p and not ann) else None
    h = jnp.zeros((B, H), jnp.float32)
    temp = jnp.zeros((B, H), jnp.float32)
    cur = jnp.zeros((B, H), jnp.float32)
    outs = []
    for t in range(T):
        xt = x[:, t, :]
        z = jax.nn.sigmoid(jnp.dot(xt, p["wzT"], precision=hp) + p["bz"]
                           + jnp.dot(h, p["uzT"], precision=hp))
        a = (jnp.dot(xt, p["wiT"], precision=hp) + bic) + jnp.dot(h, p["uiT"], precision=hp)
        if ann:
            cur = jnp.tanh(a)
            temp = z * temp + (1.0 - z) * cur
            h = temp
        else:
            cur = alpha * cur + a
            temp = z * temp + (1.0 - z) * cur - Vth * h
            h = spike_fn(temp)
        outs.append(h)
    return jnp.stack(outs, axis=1)


def ligru_forward_ref(x, params, *, bidirectional, ann=False, ternact=False):
    run = lambda p, inp: _gru_layer_ref(inp, p, ann=ann, ternact=ternact)
    cat = lambda a, b: jnp.concatenate([a, b], axis=-1)
    if bidirectional:
        o1 = run(params["l1"], x)
        o1b = run(params["l1b"], x[:, ::-1])
        o2 = run(params["l2"], cat(o1, o1b[:, ::-1]))
        o2b = run(params["l2b"], cat(o1[:, ::-1], o1b))
        o3 = run(params["l3"], cat(o2, o2b[:, ::-1]))
        o3b = run(params["l3b"], cat(o2[:, ::-1], o2b))
        return cat(o3, o3b), cat(o2, o2b), cat(o1, o1b)
    o1 = run(params["l1"], x)
    o2 = run(params["l2"], o1)
    o3 = run(params["l3"], o2)
    return o3, o2, o1


def init_gru_params(key, input_size, hidden_size):
    k = float(np.sqrt(1.0 / hidden_size))
    ks = jax.random.split(key, 7)
    u = lambda kk, shape: jax.random.uniform(kk, shape, jnp.float32, -k, k)
    return dict(
        wzT=u(ks[0], (input_size, hidden_size)),
        wiT=u(ks[1], (input_size, hidden_size)),
        uzT=u(ks[2], (hidden_size, hidden_size)),   # uz: no bias
        uiT=u(ks[3], (hidden_size, hidden_size)),
        bz=u(ks[4], (hidden_size,)),
        bi=u(ks[5], (hidden_size,)),
        bui=u(ks[6], (hidden_size,)),
        alpha=jnp.full((hidden_size,), ALPHA_INIT_GRU, jnp.float32),
    )


if __name__ == "__main__":
    B, T, D, H = 2, 8, 16, 32
    key = jax.random.PRNGKey(0)
    kx, kp = jax.random.split(key)
    x = jax.random.normal(kx, (B, T, D), dtype=jnp.float32)

    pkeys = jax.random.split(kp, 6)
    bparams = {
        "l1": init_gru_params(pkeys[0], D, H),
        "l1b": init_gru_params(pkeys[1], D, H),
        "l2": init_gru_params(pkeys[2], 2 * H, H),
        "l2b": init_gru_params(pkeys[3], 2 * H, H),
        "l3": init_gru_params(pkeys[4], 2 * H, H),
        "l3b": init_gru_params(pkeys[5], 2 * H, H),
    }
    uparams = {
        "l1": init_gru_params(pkeys[0], D, H),
        "l2": init_gru_params(pkeys[1], H, H),
        "l3": init_gru_params(pkeys[3], H, H),
    }

    # 1) Bidirectional spiking LiGRU (SpikeAct) — small target_rows so the time
    #    grid has several blocks and exercises the cross-block state carry and
    #    the reversed-stream block indexing.
    fwd_bi = jax.jit(functools.partial(ligru_forward, bidirectional=True,
                                       ann=False, ternact=False, target_rows=16))
    out3, out2, out1 = jax.block_until_ready(fwd_bi(x, bparams))
    r3, r2, r1 = ligru_forward_ref(x, bparams, bidirectional=True,
                                   ann=False, ternact=False)
    assert out3.shape == (B, T, 2 * H) and out2.shape == (B, T, 2 * H)
    np.testing.assert_allclose(np.asarray(out1), np.asarray(r1), atol=1e-5, rtol=0)
    np.testing.assert_allclose(np.asarray(out2), np.asarray(r2), atol=1e-5, rtol=0)
    np.testing.assert_allclose(np.asarray(out3), np.asarray(r3), atol=1e-5, rtol=0)

    # 2) Unidirectional, ternary spikes (SpikeAct_signed), default time blocking.
    fwd_tern = jax.jit(functools.partial(ligru_forward, bidirectional=False,
                                         ann=False, ternact=True))
    o3, o2, o1 = jax.block_until_ready(fwd_tern(x, uparams))
    q3, q2, q1 = ligru_forward_ref(x, uparams, bidirectional=False,
                                   ann=False, ternact=True)
    np.testing.assert_allclose(np.asarray(o1), np.asarray(q1), atol=1e-5, rtol=0)
    np.testing.assert_allclose(np.asarray(o2), np.asarray(q2), atol=1e-5, rtol=0)
    np.testing.assert_allclose(np.asarray(o3), np.asarray(q3), atol=1e-5, rtol=0)

    # 3) ANN mode (continuous light-GRU), unidirectional.
    fwd_ann = jax.jit(functools.partial(ligru_forward, bidirectional=False, ann=True))
    a3, a2, a1 = jax.block_until_ready(fwd_ann(x, uparams))
    b3, b2, b1 = ligru_forward_ref(x, uparams, bidirectional=False, ann=True)
    np.testing.assert_allclose(np.asarray(a3), np.asarray(b3), atol=1e-4, rtol=1e-4)

    # 4) bf16 MXU-operand path (f32 accumulation): exercise it and sanity-check
    #    that outputs are still valid spikes (exact equality with the f32
    #    reference is not guaranteed for membrane potentials near Vth).
    fwd_bf16 = jax.jit(functools.partial(ligru_forward, bidirectional=True,
                                         ann=False, ternact=False,
                                         compute_dtype=jnp.bfloat16, target_rows=16))
    s3, s2, s1 = jax.block_until_ready(fwd_bf16(x, bparams))
    assert s3.shape == (B, T, 2 * H)
    v1 = np.asarray(s1)
    assert np.all(np.isin(np.unique(v1), [0.0, 1.0]))

    print("KERNEL_OK")
</pallas_src>

<mosaic_0001>
module attributes {stable_mosaic.version = 11 : i64} {
  func.func @_gru_layer_kernel(%arg0: i32, %arg1: memref<16x16xf32, #tpu.memory_space<vmem>>, %arg2: memref<16x256xf32, #tpu.memory_space<vmem>>, %arg3: memref<128x256xf32, #tpu.memory_space<vmem>>, %arg4: memref<1x256xf32, #tpu.memory_space<vmem>>, %arg5: memref<1x128xf32, #tpu.memory_space<vmem>>, %arg6: memref<16x128xbf16, #tpu.memory_space<vmem>>, %arg7: memref<8x128xf32, #tpu.memory_space<vmem>>, %arg8: memref<8x128xf32, #tpu.memory_space<vmem>>, %arg9: memref<8x128xf32, #tpu.memory_space<vmem>>, %arg10: memref<16x256xf32, #tpu.memory_space<vmem>>) attributes {dimension_semantics = [#tpu.dimension_semantics<arbitrary>], iteration_bounds = array<i64: 4>, scalar_prefetch = 0 : i64, scratch_operands = 4 : i64, tpu.core_type = #tpu.core_type<tc>, window_params = [{transform_indices = @transform_0, window_bounds = array<i64: 16, 16>}, {pipeline_mode = #tpu.pipeline_mode<synchronous>, transform_indices = @transform_1, window_bounds = array<i64: 16, 256>}, {pipeline_mode = #tpu.pipeline_mode<synchronous>, transform_indices = @transform_2, window_bounds = array<i64: 128, 256>}, {pipeline_mode = #tpu.pipeline_mode<synchronous>, transform_indices = @transform_3, window_bounds = array<i64: 1, 256>}, {pipeline_mode = #tpu.pipeline_mode<synchronous>, transform_indices = @transform_4, window_bounds = array<i64: 1, 128>}, {transform_indices = @transform_5, window_bounds = array<i64: 16, 128>}]} {
    %c0_i32 = arith.constant 0 : i32
    %0 = arith.cmpi eq, %arg0, %c0_i32 : i32
    %1 = arith.extui %0 : i1 to i32
    %c0_i32_0 = arith.constant 0 : i32
    %2 = arith.cmpi ne, %1, %c0_i32_0 : i32
    scf.if %2 {
      %cst_43 = arith.constant 0.000000e+00 : f32
      %73 = vector.broadcast %cst_43 : f32 to vector<8x128xf32>
      %c0_44 = arith.constant 0 : index
      %c0_45 = arith.constant 0 : index
      %74 = vector.load %arg7[%c0_44, %c0_45] : memref<8x128xf32, #tpu.memory_space<vmem>>, vector<8x128xf32>
      tpu.vector_store %arg7[%c0_44, %c0_45], %73 {strides = array<i32>} : memref<8x128xf32, #tpu.memory_space<vmem>>, vector<8x128xf32>,
      %cst_46 = arith.constant 0.000000e+00 : f32
      %75 = vector.broadcast %cst_46 : f32 to vector<8x128xf32>
      %c0_47 = arith.constant 0 : index
      %c0_48 = arith.constant 0 : index
      %76 = vector.load %arg8[%c0_47, %c0_48] : memref<8x128xf32, #tpu.memory_space<vmem>>, vector<8x128xf32>
      tpu.vector_store %arg8[%c0_47, %c0_48], %75 {strides = array<i32>} : memref<8x128xf32, #tpu.memory_space<vmem>>, vector<8x128xf32>,
      %cst_49 = arith.constant 0.000000e+00 : f32
      %77 = vector.broadcast %cst_49 : f32 to vector<8x128xf32>
      %c0_50 = arith.constant 0 : index
      %c0_51 = arith.constant 0 : index
      %78 = vector.load %arg9[%c0_50, %c0_51] : memref<8x128xf32, #tpu.memory_space<vmem>>, vector<8x128xf32>
      tpu.vector_store %arg9[%c0_50, %c0_51], %77 {strides = array<i32>} : memref<8x128xf32, #tpu.memory_space<vmem>>, vector<8x128xf32>,
    } else {
    }
    %c0 = arith.constant 0 : index
    %c0_1 = arith.constant 0 : index
    %3 = vector.load %arg1[%c0, %c0_1] : memref<16x16xf32, #tpu.memory_space<vmem>>, vector<16x16xf32>
    %c0_2 = arith.constant 0 : index
    %c0_3 = arith.constant 0 : index
    %4 = vector.load %arg2[%c0_2, %c0_3] : memref<16x256xf32, #tpu.memory_space<vmem>>, vector<16x256xf32>
    %cst = arith.constant dense<0.000000e+00> : vector<16x256xf32>
    %5 = tpu.matmul %3, %4, %cst {dimension_numbers = #tpu.dot_dimension_numbers<[1], [0], [0], [1], [0, 0, 1, 1], [], []>} : vector<16x16xf32>, vector<16x256xf32>, vector<16x256xf32> -> vector<16x256xf32>
    %c0_4 = arith.constant 0 : index
    %c0_5 = arith.constant 0 : index
    %6 = vector.load %arg4[%c0_4, %c0_5] : memref<1x256xf32, #tpu.memory_space<vmem>>, vector<1x256xf32>
    %7 = vector.broadcast %6 : vector<1x256xf32> to vector<16x256xf32>
    %8 = arith.addf %5, %7 : vector<16x256xf32>
    %c0_6 = arith.constant 0 : index
    %c0_7 = arith.constant 0 : index
    %9 = vector.load %arg10[%c0_6, %c0_7] : memref<16x256xf32, #tpu.memory_space<vmem>>, vector<16x256xf32>
    tpu.vector_store %arg10[%c0_6, %c0_7], %8 {strides = array<i32>} : memref<16x256xf32, #tpu.memory_space<vmem>>, vector<16x256xf32>,
    %c0_8 = arith.constant 0 : index
    %c0_9 = arith.constant 0 : index
    %10 = vector.load %arg7[%c0_8, %c0_9] : memref<8x128xf32, #tpu.memory_space<vmem>>, vector<8x128xf32>
    %c0_10 = arith.constant 0 : index
    %c0_11 = arith.constant 0 : index
    %11 = vector.load %arg8[%c0_10, %c0_11] : memref<8x128xf32, #tpu.memory_space<vmem>>, vector<8x128xf32>
    %c0_12 = arith.constant 0 : index
    %c0_13 = arith.constant 0 : index
    %12 = vector.load %arg9[%c0_12, %c0_13] : memref<8x128xf32, #tpu.memory_space<vmem>>, vector<8x128xf32>
    %c0_14 = arith.constant 0 : index
    %c0_15 = arith.constant 0 : index
    %13 = vector.load %arg5[%c0_14, %c0_15] : memref<1x128xf32, #tpu.memory_space<vmem>>, vector<1x128xf32>
    %c0_16 = arith.constant 0 : index
    %c0_17 = arith.constant 0 : index
    %14 = vector.load %arg3[%c0_16, %c0_17] : memref<128x256xf32, #tpu.memory_space<vmem>>, vector<128x256xf32>
    %cst_18 = arith.constant dense<0.000000e+00> : vector<8x256xf32>
    %15 = tpu.matmul %10, %14, %cst_18 {dimension_numbers = #tpu.dot_dimension_numbers<[1], [0], [0], [1], [0, 0, 1, 1], [], []>} : vector<8x128xf32>, vector<128x256xf32>, vector<8x256xf32> -> vector<8x256xf32>
    %c8 = arith.constant 8 : index
    %c0_19 = arith.constant 0 : index
    %16 = vector.load %arg10[%c8, %c0_19] : memref<16x256xf32, #tpu.memory_space<vmem>>, vector<8x256xf32>
    %17 = arith.addf %15, %16 : vector<8x256xf32>
    %18 = vector.extract_strided_slice %17 {offsets = [0, 0], sizes = [8, 128], strides = [1, 1]} : vector<8x256xf32> to vector<8x128xf32>
    %19 = arith.negf %18 : vector<8x128xf32>
    %20 = math.exp %19 : vector<8x128xf32>
    %cst_20 = arith.constant 1.000000e+00 : f32
    %21 = vector.broadcast %cst_20 : f32 to vector<8x128xf32>
    %22 = arith.addf %21, %20 : vector<8x128xf32>
    %23 = arith.divf %21, %22 : vector<8x128xf32>
    %24 = vector.extract_strided_slice %17 {offsets = [0, 128], sizes = [8, 128], strides = [1, 1]} : vector<8x256xf32> to vector<8x128xf32>
    %25 = vector.broadcast %13 : vector<1x128xf32> to vector<8x128xf32>
    %26 = arith.mulf %25, %12 : vector<8x128xf32>
    %27 = arith.addf %26, %24 : vector<8x128xf32>
    %28 = arith.mulf %23, %11 : vector<8x128xf32>
    %cst_21 = arith.constant 1.000000e+00 : f32
    %29 = vector.broadcast %cst_21 : f32 to vector<8x128xf32>
    %30 = arith.subf %29, %23 : vector<8x128xf32>
    %31 = arith.mulf %30, %27 : vector<8x128xf32>
    %32 = arith.addf %28, %31 : vector<8x128xf32>
    %cst_22 = arith.constant 1.000000e+00 : f32
    %33 = vector.broadcast %cst_22 : f32 to vector<8x128xf32>
    %34 = arith.mulf %33, %10 : vector<8x128xf32>
    %35 = arith.subf %32, %34 : vector<8x128xf32>
    %cst_23 = arith.constant 1.000000e+00 : f32
    %36 = vector.broadcast %cst_23 : f32 to vector<8x128xf32>
    %37 = arith.cmpf oge, %35, %36 : vector<8x128xf32>
    %38 = arith.extui %37 : vector<8x128xi1> to vector<8x128xi32>
    %39 = arith.sitofp %38 : vector<8x128xi32> to vector<8x128xf32>
    %40 = arith.truncf %39 : vector<8x128xf32> to vector<8x128xbf16>
    %c0_24 = arith.constant 0 : index
    %c0_25 = arith.constant 0 : index
    %41 = vector.load %arg6[%c0_24, %c0_25] : memref<16x128xbf16, #tpu.memory_space<vmem>>, vector<8x128xbf16>
    tpu.vector_store %arg6[%c0_24, %c0_25], %40 {strides = array<i32>} : memref<16x128xbf16, #tpu.memory_space<vmem>>, vector<8x128xbf16>,
    %c0_26 = arith.constant 0 : index
    %c0_27 = arith.constant 0 : index
    %42 = vector.load %arg3[%c0_26, %c0_27] : memref<128x256xf32, #tpu.memory_space<vmem>>, vector<128x256xf32>
    %cst_28 = arith.constant dense<0.000000e+00> : vector<8x256xf32>
    %43 = tpu.matmul %39, %42, %cst_28 {dimension_numbers = #tpu.dot_dimension_numbers<[1], [0], [0], [1], [0, 0, 1, 1], [], []>} : vector<8x128xf32>, vector<128x256xf32>, vector<8x256xf32> -> vector<8x256xf32>
    %c0_29 = arith.constant 0 : index
    %c0_30 = arith.constant 0 : index
    %44 = vector.load %arg10[%c0_29, %c0_30] : memref<16x256xf32, #tpu.memory_space<vmem>>, vector<8x256xf32>
    %45 = arith.addf %43, %44 : vector<8x256xf32>
    %46 = vector.extract_strided_slice %45 {offsets = [0, 0], sizes = [8, 128], strides = [1, 1]} : vector<8x256xf32> to vector<8x128xf32>
    %47 = arith.negf %46 : vector<8x128xf32>
    %48 = math.exp %47 : vector<8x128xf32>
    %cst_31 = arith.constant 1.000000e+00 : f32
    %49 = vector.broadcast %cst_31 : f32 to vector<8x128xf32>
    %50 = arith.addf %49, %48 : vector<8x128xf32>
    %51 = arith.divf %49, %50 : vector<8x128xf32>
    %52 = vector.extract_strided_slice %45 {offsets = [0, 128], sizes = [8, 128], strides = [1, 1]} : vector<8x256xf32> to vector<8x128xf32>
    %53 = vector.broadcast %13 : vector<1x128xf32> to vector<8x128xf32>
    %54 = arith.mulf %53, %27 : vector<8x128xf32>
    %55 = arith.addf %54, %52 : vector<8x128xf32>
    %56 = arith.mulf %51, %35 : vector<8x128xf32>
    %cst_32 = arith.constant 1.000000e+00 : f32
    %57 = vector.broadcast %cst_32 : f32 to vector<8x128xf32>
    %58 = arith.subf %57, %51 : vector<8x128xf32>
    %59 = arith.mulf %58, %55 : vector<8x128xf32>
    %60 = arith.addf %56, %59 : vector<8x128xf32>
    %cst_33 = arith.constant 1.000000e+00 : f32
    %61 = vector.broadcast %cst_33 : f32 to vector<8x128xf32>
    %62 = arith.mulf %61, %39 : vector<8x128xf32>
    %63 = arith.subf %60, %62 : vector<8x128xf32>
    %cst_34 = arith.constant 1.000000e+00 : f32
    %64 = vector.broadcast %cst_34 : f32 to vector<8x128xf32>
    %65 = arith.cmpf oge, %63, %64 : vector<8x128xf32>
    %66 = arith.extui %65 : vector<8x128xi1> to vector<8x128xi32>
    %67 = arith.sitofp %66 : vector<8x128xi32> to vector<8x128xf32>
    %68 = arith.truncf %67 : vector<8x128xf32> to vector<8x128xbf16>
    %c8_35 = arith.constant 8 : index
    %c0_36 = arith.constant 0 : index
    %69 = vector.load %arg6[%c8_35, %c0_36] : memref<16x128xbf16, #tpu.memory_space<vmem>>, vector<8x128xbf16>
    tpu.vector_store %arg6[%c8_35, %c0_36], %68 {strides = array<i32>} : memref<16x128xbf16, #tpu.memory_space<vmem>>, vector<8x128xbf16>,
    %c0_37 = arith.constant 0 : index
    %c0_38 = arith.constant 0 : index
    %70 = vector.load %arg7[%c0_37, %c0_38] : memref<8x128xf32, #tpu.memory_space<vmem>>, vector<8x128xf32>
    tpu.vector_store %arg7[%c0_37, %c0_38], %67 {strides = array<i32>} : memref<8x128xf32, #tpu.memory_space<vmem>>, vector<8x128xf32>,
    %c0_39 = arith.constant 0 : index
    %c0_40 = arith.constant 0 : index
    %71 = vector.load %arg8[%c0_39, %c0_40] : memref<8x128xf32, #tpu.memory_space<vmem>>, vector<8x128xf32>
    tpu.vector_store %arg8[%c0_39, %c0_40], %63 {strides = array<i32>} : memref<8x128xf32, #tpu.memory_space<vmem>>, vector<8x128xf32>,
    %c0_41 = arith.constant 0 : index
    %c0_42 = arith.constant 0 : index
    %72 = vector.load %arg9[%c0_41, %c0_42] : memref<8x128xf32, #tpu.memory_space<vmem>>, vector<8x128xf32>
    tpu.vector_store %arg9[%c0_41, %c0_42], %55 {strides = array<i32>} : memref<8x128xf32, #tpu.memory_space<vmem>>, vector<8x128xf32>,
    return
  }
  func.func @transform_0(%arg0: i32) -> (i32, i32) {
    %c3_i32 = arith.constant 3 : i32
    %0 = arith.subi %c3_i32, %arg0 : i32
    %c0_i32 = arith.constant 0 : i32
    %c0_i32_0 = arith.constant 0 : i32
    return %0, %c0_i32 : i32, i32
  }
  func.func @transform_1(%arg0: i32) -> (i32, i32) {
    %c0_i32 = arith.constant 0 : i32
    %c0_i32_0 = arith.constant 0 : i32
    %c0_i32_1 = arith.constant 0 : i32
    return %c0_i32, %c0_i32_0 : i32, i32
  }
  func.func @transform_2(%arg0: i32) -> (i32, i32) {
    %c0_i32 = arith.constant 0 : i32
    %c0_i32_0 = arith.constant 0 : i32
    %c0_i32_1 = arith.constant 0 : i32
    return %c0_i32, %c0_i32_0 : i32, i32
  }
  func.func @transform_3(%arg0: i32) -> (i32, i32) {
    %c0_i32 = arith.constant 0 : i32
    %c0_i32_0 = arith.constant 0 : i32
    %c0_i32_1 = arith.constant 0 : i32
    return %c0_i32, %c0_i32_0 : i32, i32
  }
  func.func @transform_4(%arg0: i32) -> (i32, i32) {
    %c0_i32 = arith.constant 0 : i32
    %c0_i32_0 = arith.constant 0 : i32
    %c0_i32_1 = arith.constant 0 : i32
    return %c0_i32, %c0_i32_0 : i32, i32
  }
  func.func @transform_5(%arg0: i32) -> (i32, i32) {
    %c0_i32 = arith.constant 0 : i32
    %c0_i32_0 = arith.constant 0 : i32
    return %arg0, %c0_i32 : i32, i32
  }
}

module attributes {stable_mosaic.version = 11 : i64} {
  func.func @_gru_layer_kernel(%arg0: i32, %arg1: memref<16x16xf32, #tpu.memory_space<vmem>>, %arg2: memref<16x256xf32, #tpu.memory_space<vmem>>, %arg3: memref<128x256xf32, #tpu.memory_space<vmem>>, %arg4: memref<1x256xf32, #tpu.memory_space<vmem>>, %arg5: memref<1x128xf32, #tpu.memory_space<vmem>>, %arg6: memref<16x128xbf16, #tpu.memory_space<vmem>>, %arg7: memref<8x128xf32, #tpu.memory_space<vmem>>, %arg8: memref<8x128xf32, #tpu.memory_space<vmem>>, %arg9: memref<8x128xf32, #tpu.memory_space<vmem>>, %arg10: memref<16x256xf32, #tpu.memory_space<vmem>>) attributes {dimension_semantics = [#tpu.dimension_semantics<arbitrary>], iteration_bounds = array<i64: 4>, scalar_prefetch = 0 : i64, scratch_operands = 4 : i64, tpu.core_type = #tpu.core_type<tc>, window_params = [{transform_indices = @transform_0, window_bounds = array<i64: 16, 16>}, {pipeline_mode = #tpu.pipeline_mode<synchronous>, transform_indices = @transform_1, window_bounds = array<i64: 16, 256>}, {pipeline_mode = #tpu.pipeline_mode<synchronous>, transform_indices = @transform_2, window_bounds = array<i64: 128, 256>}, {pipeline_mode = #tpu.pipeline_mode<synchronous>, transform_indices = @transform_3, window_bounds = array<i64: 1, 256>}, {pipeline_mode = #tpu.pipeline_mode<synchronous>, transform_indices = @transform_4, window_bounds = array<i64: 1, 128>}, {transform_indices = @transform_5, window_bounds = array<i64: 16, 128>}]} {
    %c0_i32 = arith.constant 0 : i32
    %0 = arith.cmpi eq, %arg0, %c0_i32 : i32
    %1 = arith.extui %0 : i1 to i32
    %c0_i32_0 = arith.constant 0 : i32
    %2 = arith.cmpi ne, %1, %c0_i32_0 : i32
    scf.if %2 {
      %cst_43 = arith.constant 0.000000e+00 : f32
      %73 = vector.broadcast %cst_43 : f32 to vector<8x128xf32>
      %c0_44 = arith.constant 0 : index
      %c0_45 = arith.constant 0 : index
      %74 = vector.load %arg7[%c0_44, %c0_45] : memref<8x128xf32, #tpu.memory_space<vmem>>, vector<8x128xf32>
      tpu.vector_store %arg7[%c0_44, %c0_45], %73 {strides = array<i32>} : memref<8x128xf32, #tpu.memory_space<vmem>>, vector<8x128xf32>,
      %cst_46 = arith.constant 0.000000e+00 : f32
      %75 = vector.broadcast %cst_46 : f32 to vector<8x128xf32>
      %c0_47 = arith.constant 0 : index
      %c0_48 = arith.constant 0 : index
      %76 = vector.load %arg8[%c0_47, %c0_48] : memref<8x128xf32, #tpu.memory_space<vmem>>, vector<8x128xf32>
      tpu.vector_store %arg8[%c0_47, %c0_48], %75 {strides = array<i32>} : memref<8x128xf32, #tpu.memory_space<vmem>>, vector<8x128xf32>,
      %cst_49 = arith.constant 0.000000e+00 : f32
      %77 = vector.broadcast %cst_49 : f32 to vector<8x128xf32>
      %c0_50 = arith.constant 0 : index
      %c0_51 = arith.constant 0 : index
      %78 = vector.load %arg9[%c0_50, %c0_51] : memref<8x128xf32, #tpu.memory_space<vmem>>, vector<8x128xf32>
      tpu.vector_store %arg9[%c0_50, %c0_51], %77 {strides = array<i32>} : memref<8x128xf32, #tpu.memory_space<vmem>>, vector<8x128xf32>,
    } else {
    }
    %c0 = arith.constant 0 : index
    %c0_1 = arith.constant 0 : index
    %3 = vector.load %arg1[%c0, %c0_1] : memref<16x16xf32, #tpu.memory_space<vmem>>, vector<16x16xf32>
    %c0_2 = arith.constant 0 : index
    %c0_3 = arith.constant 0 : index
    %4 = vector.load %arg2[%c0_2, %c0_3] : memref<16x256xf32, #tpu.memory_space<vmem>>, vector<16x256xf32>
    %cst = arith.constant dense<0.000000e+00> : vector<16x256xf32>
    %5 = tpu.matmul %3, %4, %cst {dimension_numbers = #tpu.dot_dimension_numbers<[1], [0], [0], [1], [0, 0, 1, 1], [], []>} : vector<16x16xf32>, vector<16x256xf32>, vector<16x256xf32> -> vector<16x256xf32>
    %c0_4 = arith.constant 0 : index
    %c0_5 = arith.constant 0 : index
    %6 = vector.load %arg4[%c0_4, %c0_5] : memref<1x256xf32, #tpu.memory_space<vmem>>, vector<1x256xf32>
    %7 = vector.broadcast %6 : vector<1x256xf32> to vector<16x256xf32>
    %8 = arith.addf %5, %7 : vector<16x256xf32>
    %c0_6 = arith.constant 0 : index
    %c0_7 = arith.constant 0 : index
    %9 = vector.load %arg10[%c0_6, %c0_7] : memref<16x256xf32, #tpu.memory_space<vmem>>, vector<16x256xf32>
    tpu.vector_store %arg10[%c0_6, %c0_7], %8 {strides = array<i32>} : memref<16x256xf32, #tpu.memory_space<vmem>>, vector<16x256xf32>,
    %c0_8 = arith.constant 0 : index
    %c0_9 = arith.constant 0 : index
    %10 = vector.load %arg7[%c0_8, %c0_9] : memref<8x128xf32, #tpu.memory_space<vmem>>, vector<8x128xf32>
    %c0_10 = arith.constant 0 : index
    %c0_11 = arith.constant 0 : index
    %11 = vector.load %arg8[%c0_10, %c0_11] : memref<8x128xf32, #tpu.memory_space<vmem>>, vector<8x128xf32>
    %c0_12 = arith.constant 0 : index
    %c0_13 = arith.constant 0 : index
    %12 = vector.load %arg9[%c0_12, %c0_13] : memref<8x128xf32, #tpu.memory_space<vmem>>, vector<8x128xf32>
    %c0_14 = arith.constant 0 : index
    %c0_15 = arith.constant 0 : index
    %13 = vector.load %arg5[%c0_14, %c0_15] : memref<1x128xf32, #tpu.memory_space<vmem>>, vector<1x128xf32>
    %c0_16 = arith.constant 0 : index
    %c0_17 = arith.constant 0 : index
    %14 = vector.load %arg3[%c0_16, %c0_17] : memref<128x256xf32, #tpu.memory_space<vmem>>, vector<128x256xf32>
    %cst_18 = arith.constant dense<0.000000e+00> : vector<8x256xf32>
    %15 = tpu.matmul %10, %14, %cst_18 {dimension_numbers = #tpu.dot_dimension_numbers<[1], [0], [0], [1], [0, 0, 1, 1], [], []>} : vector<8x128xf32>, vector<128x256xf32>, vector<8x256xf32> -> vector<8x256xf32>
    %c0_19 = arith.constant 0 : index
    %c0_20 = arith.constant 0 : index
    %16 = vector.load %arg10[%c0_19, %c0_20] : memref<16x256xf32, #tpu.memory_space<vmem>>, vector<8x256xf32>
    %17 = arith.addf %15, %16 : vector<8x256xf32>
    %18 = vector.extract_strided_slice %17 {offsets = [0, 0], sizes = [8, 128], strides = [1, 1]} : vector<8x256xf32> to vector<8x128xf32>
    %19 = arith.negf %18 : vector<8x128xf32>
    %20 = math.exp %19 : vector<8x128xf32>
    %cst_21 = arith.constant 1.000000e+00 : f32
    %21 = vector.broadcast %cst_21 : f32 to vector<8x128xf32>
    %22 = arith.addf %21, %20 : vector<8x128xf32>
    %23 = arith.divf %21, %22 : vector<8x128xf32>
    %24 = vector.extract_strided_slice %17 {offsets = [0, 128], sizes = [8, 128], strides = [1, 1]} : vector<8x256xf32> to vector<8x128xf32>
    %25 = vector.broadcast %13 : vector<1x128xf32> to vector<8x128xf32>
    %26 = arith.mulf %25, %12 : vector<8x128xf32>
    %27 = arith.addf %26, %24 : vector<8x128xf32>
    %28 = arith.mulf %23, %11 : vector<8x128xf32>
    %cst_22 = arith.constant 1.000000e+00 : f32
    %29 = vector.broadcast %cst_22 : f32 to vector<8x128xf32>
    %30 = arith.subf %29, %23 : vector<8x128xf32>
    %31 = arith.mulf %30, %27 : vector<8x128xf32>
    %32 = arith.addf %28, %31 : vector<8x128xf32>
    %cst_23 = arith.constant 1.000000e+00 : f32
    %33 = vector.broadcast %cst_23 : f32 to vector<8x128xf32>
    %34 = arith.mulf %33, %10 : vector<8x128xf32>
    %35 = arith.subf %32, %34 : vector<8x128xf32>
    %cst_24 = arith.constant 1.000000e+00 : f32
    %36 = vector.broadcast %cst_24 : f32 to vector<8x128xf32>
    %37 = arith.cmpf oge, %35, %36 : vector<8x128xf32>
    %38 = arith.extui %37 : vector<8x128xi1> to vector<8x128xi32>
    %39 = arith.sitofp %38 : vector<8x128xi32> to vector<8x128xf32>
    %40 = arith.truncf %39 : vector<8x128xf32> to vector<8x128xbf16>
    %c0_25 = arith.constant 0 : index
    %c0_26 = arith.constant 0 : index
    %41 = vector.load %arg6[%c0_25, %c0_26] : memref<16x128xbf16, #tpu.memory_space<vmem>>, vector<8x128xbf16>
    tpu.vector_store %arg6[%c0_25, %c0_26], %40 {strides = array<i32>} : memref<16x128xbf16, #tpu.memory_space<vmem>>, vector<8x128xbf16>,
    %c0_27 = arith.constant 0 : index
    %c0_28 = arith.constant 0 : index
    %42 = vector.load %arg3[%c0_27, %c0_28] : memref<128x256xf32, #tpu.memory_space<vmem>>, vector<128x256xf32>
    %cst_29 = arith.constant dense<0.000000e+00> : vector<8x256xf32>
    %43 = tpu.matmul %39, %42, %cst_29 {dimension_numbers = #tpu.dot_dimension_numbers<[1], [0], [0], [1], [0, 0, 1, 1], [], []>} : vector<8x128xf32>, vector<128x256xf32>, vector<8x256xf32> -> vector<8x256xf32>
    %c8 = arith.constant 8 : index
    %c0_30 = arith.constant 0 : index
    %44 = vector.load %arg10[%c8, %c0_30] : memref<16x256xf32, #tpu.memory_space<vmem>>, vector<8x256xf32>
    %45 = arith.addf %43, %44 : vector<8x256xf32>
    %46 = vector.extract_strided_slice %45 {offsets = [0, 0], sizes = [8, 128], strides = [1, 1]} : vector<8x256xf32> to vector<8x128xf32>
    %47 = arith.negf %46 : vector<8x128xf32>
    %48 = math.exp %47 : vector<8x128xf32>
    %cst_31 = arith.constant 1.000000e+00 : f32
    %49 = vector.broadcast %cst_31 : f32 to vector<8x128xf32>
    %50 = arith.addf %49, %48 : vector<8x128xf32>
    %51 = arith.divf %49, %50 : vector<8x128xf32>
    %52 = vector.extract_strided_slice %45 {offsets = [0, 128], sizes = [8, 128], strides = [1, 1]} : vector<8x256xf32> to vector<8x128xf32>
    %53 = vector.broadcast %13 : vector<1x128xf32> to vector<8x128xf32>
    %54 = arith.mulf %53, %27 : vector<8x128xf32>
    %55 = arith.addf %54, %52 : vector<8x128xf32>
    %56 = arith.mulf %51, %35 : vector<8x128xf32>
    %cst_32 = arith.constant 1.000000e+00 : f32
    %57 = vector.broadcast %cst_32 : f32 to vector<8x128xf32>
    %58 = arith.subf %57, %51 : vector<8x128xf32>
    %59 = arith.mulf %58, %55 : vector<8x128xf32>
    %60 = arith.addf %56, %59 : vector<8x128xf32>
    %cst_33 = arith.constant 1.000000e+00 : f32
    %61 = vector.broadcast %cst_33 : f32 to vector<8x128xf32>
    %62 = arith.mulf %61, %39 : vector<8x128xf32>
    %63 = arith.subf %60, %62 : vector<8x128xf32>
    %cst_34 = arith.constant 1.000000e+00 : f32
    %64 = vector.broadcast %cst_34 : f32 to vector<8x128xf32>
    %65 = arith.cmpf oge, %63, %64 : vector<8x128xf32>
    %66 = arith.extui %65 : vector<8x128xi1> to vector<8x128xi32>
    %67 = arith.sitofp %66 : vector<8x128xi32> to vector<8x128xf32>
    %68 = arith.truncf %67 : vector<8x128xf32> to vector<8x128xbf16>
    %c8_35 = arith.constant 8 : index
    %c0_36 = arith.constant 0 : index
    %69 = vector.load %arg6[%c8_35, %c0_36] : memref<16x128xbf16, #tpu.memory_space<vmem>>, vector<8x128xbf16>
    tpu.vector_store %arg6[%c8_35, %c0_36], %68 {strides = array<i32>} : memref<16x128xbf16, #tpu.memory_space<vmem>>, vector<8x128xbf16>,
    %c0_37 = arith.constant 0 : index
    %c0_38 = arith.constant 0 : index
    %70 = vector.load %arg7[%c0_37, %c0_38] : memref<8x128xf32, #tpu.memory_space<vmem>>, vector<8x128xf32>
    tpu.vector_store %arg7[%c0_37, %c0_38], %67 {strides = array<i32>} : memref<8x128xf32, #tpu.memory_space<vmem>>, vector<8x128xf32>,
    %c0_39 = arith.constant 0 : index
    %c0_40 = arith.constant 0 : index
    %71 = vector.load %arg8[%c0_39, %c0_40] : memref<8x128xf32, #tpu.memory_space<vmem>>, vector<8x128xf32>
    tpu.vector_store %arg8[%c0_39, %c0_40], %63 {strides = array<i32>} : memref<8x128xf32, #tpu.memory_space<vmem>>, vector<8x128xf32>,
    %c0_41 = arith.constant 0 : index
    %c0_42 = arith.constant 0 : index
    %72 = vector.load %arg9[%c0_41, %c0_42] : memref<8x128xf32, #tpu.memory_space<vmem>>, vector<8x128xf32>
    tpu.vector_store %arg9[%c0_41, %c0_42], %55 {strides = array<i32>} : memref<8x128xf32, #tpu.memory_space<vmem>>, vector<8x128xf32>,
    return
  }
  func.func @transform_0(%arg0: i32) -> (i32, i32) {
    %c0_i32 = arith.constant 0 : i32
    %c0_i32_0 = arith.constant 0 : i32
    return %arg0, %c0_i32 : i32, i32
  }
  func.func @transform_1(%arg0: i32) -> (i32, i32) {
    %c0_i32 = arith.constant 0 : i32
    %c0_i32_0 = arith.constant 0 : i32
    %c0_i32_1 = arith.constant 0 : i32
    return %c0_i32, %c0_i32_0 : i32, i32
  }
  func.func @transform_2(%arg0: i32) -> (i32, i32) {
    %c0_i32 = arith.constant 0 : i32
    %c0_i32_0 = arith.constant 0 : i32
    %c0_i32_1 = arith.constant 0 : i32
    return %c0_i32, %c0_i32_0 : i32, i32
  }
  func.func @transform_3(%arg0: i32) -> (i32, i32) {
    %c0_i32 = arith.constant 0 : i32
    %c0_i32_0 = arith.constant 0 : i32
    %c0_i32_1 = arith.constant 0 : i32
    return %c0_i32, %c0_i32_0 : i32, i32
  }
  func.func @transform_4(%arg0: i32) -> (i32, i32) {
    %c0_i32 = arith.constant 0 : i32
    %c0_i32_0 = arith.constant 0 : i32
    %c0_i32_1 = arith.constant 0 : i32
    return %c0_i32, %c0_i32_0 : i32, i32
  }
  func.func @transform_5(%arg0: i32) -> (i32, i32) {
    %c0_i32 = arith.constant 0 : i32
    %c0_i32_0 = arith.constant 0 : i32
    return %arg0, %c0_i32 : i32, i32
  }
}

module attributes {stable_mosaic.version = 11 : i64} {
  func.func @_gru_layer_kernel(%arg0: i32, %arg1: memref<16x128xbf16, #tpu.memory_space<vmem>>, %arg2: memref<16x128xbf16, #tpu.memory_space<vmem>>, %arg3: memref<128x256xf32, #tpu.memory_space<vmem>>, %arg4: memref<128x256xf32, #tpu.memory_space<vmem>>, %arg5: memref<128x256xf32, #tpu.memory_space<vmem>>, %arg6: memref<1x256xf32, #tpu.memory_space<vmem>>, %arg7: memref<1x128xf32, #tpu.memory_space<vmem>>, %arg8: memref<16x128xbf16, #tpu.memory_space<vmem>>, %arg9: memref<8x128xf32, #tpu.memory_space<vmem>>, %arg10: memref<8x128xf32, #tpu.memory_space<vmem>>, %arg11: memref<8x128xf32, #tpu.memory_space<vmem>>, %arg12: memref<16x256xf32, #tpu.memory_space<vmem>>, %arg13: memref<16x256xf32, #tpu.memory_space<vmem>>) attributes {dimension_semantics = [#tpu.dimension_semantics<arbitrary>], iteration_bounds = array<i64: 4>, scalar_prefetch = 0 : i64, scratch_operands = 5 : i64, tpu.core_type = #tpu.core_type<tc>, window_params = [{transform_indices = @transform_0, window_bounds = array<i64: 16, 128>}, {transform_indices = @transform_1, window_bounds = array<i64: 16, 128>}, {pipeline_mode = #tpu.pipeline_mode<synchronous>, transform_indices = @transform_2, window_bounds = array<i64: 128, 256>}, {pipeline_mode = #tpu.pipeline_mode<synchronous>, transform_indices = @transform_3, window_bounds = array<i64: 128, 256>}, {pipeline_mode = #tpu.pipeline_mode<synchronous>, transform_indices = @transform_4, window_bounds = array<i64: 128, 256>}, {pipeline_mode = #tpu.pipeline_mode<synchronous>, transform_indices = @transform_5, window_bounds = array<i64: 1, 256>}, {pipeline_mode = #tpu.pipeline_mode<synchronous>, transform_indices = @transform_6, window_bounds = array<i64: 1, 128>}, {transform_indices = @transform_7, window_bounds = array<i64: 16, 128>}]} {
    %c0_i32 = arith.constant 0 : i32
    %0 = arith.cmpi eq, %arg0, %c0_i32 : i32
    %1 = arith.extui %0 : i1 to i32
    %c0_i32_0 = arith.constant 0 : i32
    %2 = arith.cmpi ne, %1, %c0_i32_0 : i32
    scf.if %2 {
      %cst_54 = arith.constant 0.000000e+00 : f32
      %83 = vector.broadcast %cst_54 : f32 to vector<8x128xf32>
      %c0_55 = arith.constant 0 : index
      %c0_56 = arith.constant 0 : index
      %84 = vector.load %arg9[%c0_55, %c0_56] : memref<8x128xf32, #tpu.memory_space<vmem>>, vector<8x128xf32>
      tpu.vector_store %arg9[%c0_55, %c0_56], %83 {strides = array<i32>} : memref<8x128xf32, #tpu.memory_space<vmem>>, vector<8x128xf32>,
      %cst_57 = arith.constant 0.000000e+00 : f32
      %85 = vector.broadcast %cst_57 : f32 to vector<8x128xf32>
      %c0_58 = arith.constant 0 : index
      %c0_59 = arith.constant 0 : index
      %86 = vector.load %arg10[%c0_58, %c0_59] : memref<8x128xf32, #tpu.memory_space<vmem>>, vector<8x128xf32>
      tpu.vector_store %arg10[%c0_58, %c0_59], %85 {strides = array<i32>} : memref<8x128xf32, #tpu.memory_space<vmem>>, vector<8x128xf32>,
      %cst_60 = arith.constant 0.000000e+00 : f32
      %87 = vector.broadcast %cst_60 : f32 to vector<8x128xf32>
      %c0_61 = arith.constant 0 : index
      %c0_62 = arith.constant 0 : index
      %88 = vector.load %arg11[%c0_61, %c0_62] : memref<8x128xf32, #tpu.memory_space<vmem>>, vector<8x128xf32>
      tpu.vector_store %arg11[%c0_61, %c0_62], %87 {strides = array<i32>} : memref<8x128xf32, #tpu.memory_space<vmem>>, vector<8x128xf32>,
    } else {
    }
    %c0 = arith.constant 0 : index
    %c0_1 = arith.constant 0 : index
    %3 = vector.load %arg1[%c0, %c0_1] : memref<16x128xbf16, #tpu.memory_space<vmem>>, vector<16x128xbf16>
    %4 = arith.extf %3 : vector<16x128xbf16> to vector<16x128xf32>
    %c0_2 = arith.constant 0 : index
    %c0_3 = arith.constant 0 : index
    %5 = vector.load %arg3[%c0_2, %c0_3] : memref<128x256xf32, #tpu.memory_space<vmem>>, vector<128x256xf32>
    %cst = arith.constant dense<0.000000e+00> : vector<16x256xf32>
    %6 = tpu.matmul %4, %5, %cst {dimension_numbers = #tpu.dot_dimension_numbers<[1], [0], [0], [1], [0, 0, 1, 1], [], []>} : vector<16x128xf32>, vector<128x256xf32>, vector<16x256xf32> -> vector<16x256xf32>
    %c0_4 = arith.constant 0 : index
    %c0_5 = arith.constant 0 : index
    %7 = vector.load %arg6[%c0_4, %c0_5] : memref<1x256xf32, #tpu.memory_space<vmem>>, vector<1x256xf32>
    %8 = vector.broadcast %7 : vector<1x256xf32> to vector<16x256xf32>
    %9 = arith.addf %6, %8 : vector<16x256xf32>
    %c0_6 = arith.constant 0 : index
    %c0_7 = arith.constant 0 : index
    %10 = vector.load %arg12[%c0_6, %c0_7] : memref<16x256xf32, #tpu.memory_space<vmem>>, vector<16x256xf32>
    tpu.vector_store %arg12[%c0_6, %c0_7], %9 {strides = array<i32>} : memref<16x256xf32, #tpu.memory_space<vmem>>, vector<16x256xf32>,
    %c0_8 = arith.constant 0 : index
    %c0_9 = arith.constant 0 : index
    %11 = vector.load %arg2[%c0_8, %c0_9] : memref<16x128xbf16, #tpu.memory_space<vmem>>, vector<16x128xbf16>
    %12 = arith.extf %11 : vector<16x128xbf16> to vector<16x128xf32>
    %c0_10 = arith.constant 0 : index
    %c0_11 = arith.constant 0 : index
    %13 = vector.load %arg4[%c0_10, %c0_11] : memref<128x256xf32, #tpu.memory_space<vmem>>, vector<128x256xf32>
    %cst_12 = arith.constant dense<0.000000e+00> : vector<16x256xf32>
    %14 = tpu.matmul %12, %13, %cst_12 {dimension_numbers = #tpu.dot_dimension_numbers<[1], [0], [0], [1], [0, 0, 1, 1], [], []>} : vector<16x128xf32>, vector<128x256xf32>, vector<16x256xf32> -> vector<16x256xf32>
    %c0_13 = arith.constant 0 : index
    %c0_14 = arith.constant 0 : index
    %15 = vector.load %arg13[%c0_13, %c0_14] : memref<16x256xf32, #tpu.memory_space<vmem>>, vector<16x256xf32>
    tpu.vector_store %arg13[%c0_13, %c0_14], %14 {strides = array<i32>} : memref<16x256xf32, #tpu.memory_space<vmem>>, vector<16x256xf32>,
    %c0_15 = arith.constant 0 : index
    %c0_16 = arith.constant 0 : index
    %16 = vector.load %arg9[%c0_15, %c0_16] : memref<8x128xf32, #tpu.memory_space<vmem>>, vector<8x128xf32>
    %c0_17 = arith.constant 0 : index
    %c0_18 = arith.constant 0 : index
    %17 = vector.load %arg10[%c0_17, %c0_18] : memref<8x128xf32, #tpu.memory_space<vmem>>, vector<8x128xf32>
    %c0_19 = arith.constant 0 : index
    %c0_20 = arith.constant 0 : index
    %18 = vector.load %arg11[%c0_19, %c0_20] : memref<8x128xf32, #tpu.memory_space<vmem>>, vector<8x128xf32>
    %c0_21 = arith.constant 0 : index
    %c0_22 = arith.constant 0 : index
    %19 = vector.load %arg7[%c0_21, %c0_22] : memref<1x128xf32, #tpu.memory_space<vmem>>, vector<1x128xf32>
    %c0_23 = arith.constant 0 : index
    %c0_24 = arith.constant 0 : index
    %20 = vector.load %arg5[%c0_23, %c0_24] : memref<128x256xf32, #tpu.memory_space<vmem>>, vector<128x256xf32>
    %cst_25 = arith.constant dense<0.000000e+00> : vector<8x256xf32>
    %21 = tpu.matmul %16, %20, %cst_25 {dimension_numbers = #tpu.dot_dimension_numbers<[1], [0], [0], [1], [0, 0, 1, 1], [], []>} : vector<8x128xf32>, vector<128x256xf32>, vector<8x256xf32> -> vector<8x256xf32>
    %c0_26 = arith.constant 0 : index
    %c0_27 = arith.constant 0 : index
    %22 = vector.load %arg12[%c0_26, %c0_27] : memref<16x256xf32, #tpu.memory_space<vmem>>, vector<8x256xf32>
    %23 = arith.addf %21, %22 : vector<8x256xf32>
    %c8 = arith.constant 8 : index
    %c0_28 = arith.constant 0 : index
    %24 = vector.load %arg13[%c8, %c0_28] : memref<16x256xf32, #tpu.memory_space<vmem>>, vector<8x256xf32>
    %25 = arith.addf %23, %24 : vector<8x256xf32>
    %26 = vector.extract_strided_slice %25 {offsets = [0, 0], sizes = [8, 128], strides = [1, 1]} : vector<8x256xf32> to vector<8x128xf32>
    %27 = arith.negf %26 : vector<8x128xf32>
    %28 = math.exp %27 : vector<8x128xf32>
    %cst_29 = arith.constant 1.000000e+00 : f32
    %29 = vector.broadcast %cst_29 : f32 to vector<8x128xf32>
    %30 = arith.addf %29, %28 : vector<8x128xf32>
    %31 = arith.divf %29, %30 : vector<8x128xf32>
    %32 = vector.extract_strided_slice %25 {offsets = [0, 128], sizes = [8, 128], strides = [1, 1]} : vector<8x256xf32> to vector<8x128xf32>
    %33 = vector.broadcast %19 : vector<1x128xf32> to vector<8x128xf32>
    %34 = arith.mulf %33, %18 : vector<8x128xf32>
    %35 = arith.addf %34, %32 : vector<8x128xf32>
    %36 = arith.mulf %31, %17 : vector<8x128xf32>
    %cst_30 = arith.constant 1.000000e+00 : f32
    %37 = vector.broadcast %cst_30 : f32 to vector<8x128xf32>
    %38 = arith.subf %37, %31 : vector<8x128xf32>
    %39 = arith.mulf %38, %35 : vector<8x128xf32>
    %40 = arith.addf %36, %39 : vector<8x128xf32>
    %cst_31 = arith.constant 1.000000e+00 : f32
    %41 = vector.broadcast %cst_31 : f32 to vector<8x128xf32>
    %42 = arith.mulf %41, %16 : vector<8x128xf32>
    %43 = arith.subf %40, %42 : vector<8x128xf32>
    %cst_32 = arith.constant 1.000000e+00 : f32
    %44 = vector.broadcast %cst_32 : f32 to vector<8x128xf32>
    %45 = arith.cmpf oge, %43, %44 : vector<8x128xf32>
    %46 = arith.extui %45 : vector<8x128xi1> to vector<8x128xi32>
    %47 = arith.sitofp %46 : vector<8x128xi32> to vector<8x128xf32>
    %48 = arith.truncf %47 : vector<8x128xf32> to vector<8x128xbf16>
    %c0_33 = arith.constant 0 : index
    %c0_34 = arith.constant 0 : index
    %49 = vector.load %arg8[%c0_33, %c0_34] : memref<16x128xbf16, #tpu.memory_space<vmem>>, vector<8x128xbf16>
    tpu.vector_store %arg8[%c0_33, %c0_34], %48 {strides = array<i32>} : memref<16x128xbf16, #tpu.memory_space<vmem>>, vector<8x128xbf16>,
    %c0_35 = arith.constant 0 : index
    %c0_36 = arith.constant 0 : index
    %50 = vector.load %arg5[%c0_35, %c0_36] : memref<128x256xf32, #tpu.memory_space<vmem>>, vector<128x256xf32>
    %cst_37 = arith.constant dense<0.000000e+00> : vector<8x256xf32>
    %51 = tpu.matmul %47, %50, %cst_37 {dimension_numbers = #tpu.dot_dimension_numbers<[1], [0], [0], [1], [0, 0, 1, 1], [], []>} : vector<8x128xf32>, vector<128x256xf32>, vector<8x256xf32> -> vector<8x256xf32>
    %c8_38 = arith.constant 8 : index
    %c0_39 = arith.constant 0 : index
    %52 = vector.load %arg12[%c8_38, %c0_39] : memref<16x256xf32, #tpu.memory_space<vmem>>, vector<8x256xf32>
    %53 = arith.addf %51, %52 : vector<8x256xf32>
    %c0_40 = arith.constant 0 : index
    %c0_41 = arith.constant 0 : index
    %54 = vector.load %arg13[%c0_40, %c0_41] : memref<16x256xf32, #tpu.memory_space<vmem>>, vector<8x256xf32>
    %55 = arith.addf %53, %54 : vector<8x256xf32>
    %56 = vector.extract_strided_slice %55 {offsets = [0, 0], sizes = [8, 128], strides = [1, 1]} : vector<8x256xf32> to vector<8x128xf32>
    %57 = arith.negf %56 : vector<8x128xf32>
    %58 = math.exp %57 : vector<8x128xf32>
    %cst_42 = arith.constant 1.000000e+00 : f32
    %59 = vector.broadcast %cst_42 : f32 to vector<8x128xf32>
    %60 = arith.addf %59, %58 : vector<8x128xf32>
    %61 = arith.divf %59, %60 : vector<8x128xf32>
    %62 = vector.extract_strided_slice %55 {offsets = [0, 128], sizes = [8, 128], strides = [1, 1]} : vector<8x256xf32> to vector<8x128xf32>
    %63 = vector.broadcast %19 : vector<1x128xf32> to vector<8x128xf32>
    %64 = arith.mulf %63, %35 : vector<8x128xf32>
    %65 = arith.addf %64, %62 : vector<8x128xf32>
    %66 = arith.mulf %61, %43 : vector<8x128xf32>
    %cst_43 = arith.constant 1.000000e+00 : f32
    %67 = vector.broadcast %cst_43 : f32 to vector<8x128xf32>
    %68 = arith.subf %67, %61 : vector<8x128xf32>
    %69 = arith.mulf %68, %65 : vector<8x128xf32>
    %70 = arith.addf %66, %69 : vector<8x128xf32>
    %cst_44 = arith.constant 1.000000e+00 : f32
    %71 = vector.broadcast %cst_44 : f32 to vector<8x128xf32>
    %72 = arith.mulf %71, %47 : vector<8x128xf32>
    %73 = arith.subf %70, %72 : vector<8x128xf32>
    %cst_45 = arith.constant 1.000000e+00 : f32
    %74 = vector.broadcast %cst_45 : f32 to vector<8x128xf32>
    %75 = arith.cmpf oge, %73, %74 : vector<8x128xf32>
    %76 = arith.extui %75 : vector<8x128xi1> to vector<8x128xi32>
    %77 = arith.sitofp %76 : vector<8x128xi32> to vector<8x128xf32>
    %78 = arith.truncf %77 : vector<8x128xf32> to vector<8x128xbf16>
    %c8_46 = arith.constant 8 : index
    %c0_47 = arith.constant 0 : index
    %79 = vector.load %arg8[%c8_46, %c0_47] : memref<16x128xbf16, #tpu.memory_space<vmem>>, vector<8x128xbf16>
    tpu.vector_store %arg8[%c8_46, %c0_47], %78 {strides = array<i32>} : memref<16x128xbf16, #tpu.memory_space<vmem>>, vector<8x128xbf16>,
    %c0_48 = arith.constant 0 : index
    %c0_49 = arith.constant 0 : index
    %80 = vector.load %arg9[%c0_48, %c0_49] : memref<8x128xf32, #tpu.memory_space<vmem>>, vector<8x128xf32>
    tpu.vector_store %arg9[%c0_48, %c0_49], %77 {strides = array<i32>} : memref<8x128xf32, #tpu.memory_space<vmem>>, vector<8x128xf32>,
    %c0_50 = arith.constant 0 : index
    %c0_51 = arith.constant 0 : index
    %81 = vector.load %arg10[%c0_50, %c0_51] : memref<8x128xf32, #tpu.memory_space<vmem>>, vector<8x128xf32>
    tpu.vector_store %arg10[%c0_50, %c0_51], %73 {strides = array<i32>} : memref<8x128xf32, #tpu.memory_space<vmem>>, vector<8x128xf32>,
    %c0_52 = arith.constant 0 : index
    %c0_53 = arith.constant 0 : index
    %82 = vector.load %arg11[%c0_52, %c0_53] : memref<8x128xf32, #tpu.memory_space<vmem>>, vector<8x128xf32>
    tpu.vector_store %arg11[%c0_52, %c0_53], %65 {strides = array<i32>} : memref<8x128xf32, #tpu.memory_space<vmem>>, vector<8x128xf32>,
    return
  }
  func.func @transform_0(%arg0: i32) -> (i32, i32) {
    %c0_i32 = arith.constant 0 : i32
    %c0_i32_0 = arith.constant 0 : i32
    return %arg0, %c0_i32 : i32, i32
  }
  func.func @transform_1(%arg0: i32) -> (i32, i32) {
    %c3_i32 = arith.constant 3 : i32
    %0 = arith.subi %c3_i32, %arg0 : i32
    %c0_i32 = arith.constant 0 : i32
    %c0_i32_0 = arith.constant 0 : i32
    return %0, %c0_i32 : i32, i32
  }
  func.func @transform_2(%arg0: i32) -> (i32, i32) {
    %c0_i32 = arith.constant 0 : i32
    %c0_i32_0 = arith.constant 0 : i32
    %c0_i32_1 = arith.constant 0 : i32
    return %c0_i32, %c0_i32_0 : i32, i32
  }
  func.func @transform_3(%arg0: i32) -> (i32, i32) {
    %c0_i32 = arith.constant 0 : i32
    %c0_i32_0 = arith.constant 0 : i32
    %c0_i32_1 = arith.constant 0 : i32
    return %c0_i32, %c0_i32_0 : i32, i32
  }
  func.func @transform_4(%arg0: i32) -> (i32, i32) {
    %c0_i32 = arith.constant 0 : i32
    %c0_i32_0 = arith.constant 0 : i32
    %c0_i32_1 = arith.constant 0 : i32
    return %c0_i32, %c0_i32_0 : i32, i32
  }
  func.func @transform_5(%arg0: i32) -> (i32, i32) {
    %c0_i32 = arith.constant 0 : i32
    %c0_i32_0 = arith.constant 0 : i32
    %c0_i32_1 = arith.constant 0 : i32
    return %c0_i32, %c0_i32_0 : i32, i32
  }
  func.func @transform_6(%arg0: i32) -> (i32, i32) {
    %c0_i32 = arith.constant 0 : i32
    %c0_i32_0 = arith.constant 0 : i32
    %c0_i32_1 = arith.constant 0 : i32
    return %c0_i32, %c0_i32_0 : i32, i32
  }
  func.func @transform_7(%arg0: i32) -> (i32, i32) {
    %c0_i32 = arith.constant 0 : i32
    %c0_i32_0 = arith.constant 0 : i32
    return %arg0, %c0_i32 : i32, i32
  }
}

</mosaic_0001>

<bundles_post_ra>
// kernel: ligru_forward.6
= control target key start
LH: loop header
LB: loop body
LE: loop exit
PB: predicated region body
PF: predicated region fallthrough
CT: control target
= control target key end

     0   :  { %s736_s18 = smov 0   ;;  %s883_s0 = inlined_call_operand.vmem [shape: f32[64,16], index: 0, kind: input, shape index: {}]   ;;  %s884_s1 = inlined_call_operand.vmem [shape: f32[16,256], index: 1, kind: input, shape index: {}]   ;;  %s885_s2 = inlined_call_operand.vmem [shape: f32[128,256], index: 2, kind: input, shape index: {}]   ;;  %s886_s3 = inlined_call_operand.vmem [shape: f32[1,256], index: 3, kind: input, shape index: {}]   ;;  %s887_s4 = inlined_call_operand.vmem [shape: f32[1,128], index: 4, kind: input, shape index: {}]   ;;  %s888_s5 = inlined_call_operand.vmem [shape: bf16[64,128], index: 5, kind: output, shape index: {}]  }
   0x1 LB: > { %s656_s19 = sadd.s32 4294967295, %s701_s18   ;;  %p660_p0 = scmp.ge.s32.totalorder %s701_s18, 1  ;;  %s701_s18 = sphi %s736_s18, %s15_s18  }
   0x2   : > { %p188_p1 = scmp.lt.s32.totalorder %s701_s18, 5 }
   0x4   : > { %p189_p2 = pnand %p660_p0, %p188_p1 }
   0x5   : > { %s661_s20 = sshll.u32 (!%p189_p2), %s656_s19, 1  ;;  %p665_p4 = scmp.ne.s32.totalorder (!%p189_p2), %s656_s19, 0 }
   0x6   : > { %192 = sbr.rel (%p189_p2) target bundleno = 528 (0x210), region = 40  ;;  %p217_p3 = scmp.lt.s32.totalorder (!%p189_p2), %s661_s20, 7 }
   0xb   : > { %s890_s20 = smov (!%p217_p3, %s661_s20), 7  ;;  %231 = sbr.rel (%p665_p4) target bundleno = 19 (0x13), region = 44 }
   0xc   : > { %s662_s21 = sshll.u32 %s890_s20, 3  ;;  %s664_s22 = sshll.u32 %s890_s20, 2 }
   0xd   : > { %s747_s25 = scalar_lea.vmem %s883_s0, %s662_s21  ;;  %s752_s28 = scalar_lea.vmem %s888_s5, %s664_s22 }
  0x10   : > { %v703_v0 = vmov 0.0  }
  0x11   : > { %232 = vst [vmem:[#allocation2] sm:$0xff] %v703_v0  ;;  %233 = vst [vmem:[#allocation3] sm:$0xff] %v703_v0 }
  0x12   : > { %234 = vst [vmem:[#allocation4] sm:$0xff] %v703_v0 }
  0x13 PF: > { %v376_v1 = vld [vmem:[%s885_s2 + $0xf8] sm:$0xff]  ;;  %v375_v2 = vld [vmem:[%s885_s2 + $0xf0] sm:$0xff]  ;;  %v374_v3 = vld [vmem:[%s885_s2 + $0xe8] sm:$0xff]  ;;  %v704_v5 = vmov 0.0   ;;  %vm253_vm0 = vcmask 130048   ;;  %v243_v41 = vlaneseq }
  0x14   : > { %379 = vmatprep.subr.mxu1 %v376_v1  ;;  %v373_v4 = vld [vmem:[%s885_s2 + $0xe0] sm:$0xff]  ;;  %324 = vmatprep.mubr.f32.mxu0 %v704_v5  ;;  %v372_v6 = vld [vmem:[%s885_s2 + $0xd8] sm:$0xff]  ;;  %v371_v7 = vld [vmem:[%s885_s2 + $0xd0] sm:$0xff] }
  0x15   : > { %380 = vmatpush1.msra.mxu1 %v375_v2  ;;  %443 = vmatprep.mubr.f32.mxu1 %v704_v5  ;;  %v370_v8 = vld [vmem:[%s885_s2 + $0xc8] sm:$0xff]  ;;  %v369_v9 = vld [vmem:[%s885_s2 + $0xc0] sm:$0xff]  ;;  %v368_v10 = vld [vmem:[%s885_s2 + $0xb8] sm:$0xff]  ;;  %v244_v42 = vshrl.u32 %v243_v41, 7 }
  0x16   : > { %381 = vmatprep.subr.mxu1 %v374_v3  ;;  %v367_v11 = vld [vmem:[%s885_s2 + $0xb0] sm:$0xff]  ;;  %v366_v12 = vld [vmem:[%s885_s2 + $0xa8] sm:$0xff]  ;;  %v240_v13 = vld [vmem:[%s884_s1 + $0x18] sm:$0xff] }
  0x17   : > { %382 = vmatpush1.msra.mxu1 %v373_v4  ;;  %v239_v14 = vld [vmem:[%s884_s1 + $0x10] sm:$0xff]  ;;  %v365_v15 = vld [vmem:[%s885_s2 + $0xa0] sm:$0xff]  ;;  %288 = vmatprep.subr.mxu0 %v240_v13  ;;  %v238_v16 = vld [vmem:[%s884_s1 + $0x8] sm:$0xff]  ;;  %v245_v43 = vsub.s32 0, %v244_v42  ;;  %v249_v53 = vsub.s32 1, %v244_v42 }
  0x18   : > { %383 = vmatprep.subr.mxu1 %v372_v6  ;;  %v364_v17 = vld [vmem:[%s885_s2 + $0x98] sm:$0xff]  ;;  %289 = vmatpush1.msra.mxu0 %v239_v14  ;;  %v237_v18 = vld [vmem:[%s884_s1] sm:$0xff]  ;;  %v363_v20 = vld [vmem:[%s885_s2 + $0x90] sm:$0xff] }
  0x19   : > { %384 = vmatpush1.msra.mxu1 %v371_v7  ;;  %v235_v19 = vld [vmem:[%s747_s25] sm:$0xff]  ;;  %290 = vmatprep.subr.mxu0 %v238_v16  ;;  %v362_v21 = vld [vmem:[%s885_s2 + $0x88] sm:$0xff]  ;;  %v360_v23 = vld [vmem:[%s885_s2 + $0x78] sm:$0xff] }
  0x1a   : > { %385 = vmatprep.subr.mxu1 %v370_v8  ;;  %291 = vmatpush1.msra.mxu0 %v237_v18  ;;  %v361_v22 = vld [vmem:[%s885_s2 + $0x80] sm:$0xff]  ;;  %v359_v24 = vld [vmem:[%s885_s2 + $0x70] sm:$0xff]  ;;  %v358_v25 = vld [vmem:[%s885_s2 + $0x68] sm:$0xff] }
  0x1b   : > { %386 = vmatpush1.msra.mxu1 %v369_v9  ;;  %666 = vmatmul.mubr.msk.f32.vlgmr.msra.gmra.mxu0 %vm253_vm0, %v235_v19  ;;  %v357_v26 = vld [vmem:[%s885_s2 + $0x60] sm:$0xff]  ;;  %v356_v27 = vld [vmem:[%s885_s2 + $0x58] sm:$0xff]  ;;  %v355_v28 = vld [vmem:[%s885_s2 + $0x50] sm:$0xff] }
  0x1c   : > { %387 = vmatprep.subr.mxu1 %v368_v10  ;;  %508 = vmatprep.subr.mxu0 %v376_v1  ;;  %v354_v29 = vld [vmem:[%s885_s2 + $0x48] sm:$0xff]  ;;  %v353_v30 = vld [vmem:[%s885_s2 + $0x40] sm:$0xff]  ;;  %v352_v31 = vld [vmem:[%s885_s2 + $0x38] sm:$0xff] }
  0x1d   : > { %388 = vmatpush1.msra.mxu1 %v367_v11  ;;  %509 = vmatpush1.msra.mxu0 %v375_v2  ;;  %v351_v32 = vld [vmem:[%s885_s2 + $0x30] sm:$0xff]  ;;  %v350_v33 = vld [vmem:[%s885_s2 + $0x28] sm:$0xff]  ;;  %v349_v34 = vld [vmem:[%s885_s2 + $0x20] sm:$0xff] }
  0x1e   : > { %389 = vmatprep.subr.mxu1 %v366_v12  ;;  %510 = vmatprep.subr.mxu0 %v374_v3  ;;  %v348_v35 = vld [vmem:[%s885_s2 + $0x18] sm:$0xff]  ;;  %v347_v36 = vld [vmem:[%s885_s2 + $0x10] sm:$0xff]  ;;  %v346_v37 = vld [vmem:[%s885_s2 + $0x8] sm:$0xff] }
  0x1f   : > { %390 = vmatpush1.msra.mxu1 %v365_v15  ;;  %511 = vmatpush1.msra.mxu0 %v373_v4  ;;  %v345_v38 = vld [vmem:[%s885_s2] sm:$0xff]  ;;  %v236_v40 = vld [vmem:[%s747_s25 + $0x8] sm:$0xff]  ;;  %v343_v56 = vld [vmem:[#allocation4] sm:$0xff] }
  0x20   : > { %391 = vmatprep.subr.mxu1 %v364_v17  ;;  %512 = vmatprep.subr.mxu0 %v372_v6  ;;  %v341_v39 = vld [vmem:[#allocation2] sm:$0xff]  ;;  %v342_v63 = vld [vmem:[#allocation3] sm:$0xff] }
  0x21   : > { %392 = vmatpush1.msra.mxu1 %v363_v20  ;;  %513 = vmatpush1.msra.mxu0 %v371_v7  ;;  %v241_v44 = vld [vmem:[%s886_s3] sm:$0x3]  ;;  %v705_v7 = vmov 1.0  }
  0x22   : > { %393 = vmatprep.subr.mxu1 %v362_v21  ;;  %514 = vmatprep.subr.mxu0 %v370_v8  ;;  %v246_v45 = vrot.slane %v241_v44, %v245_v43  ;;  %v250_v54 = vrot.slane %v241_v44, %v249_v53  ;;  %v669_v57 = vld [vmem:[%s887_s4] ss:$0 sm:$0xff] }
  0x23   : > { %394 = vmatpush1.msra.mxu1 %v361_v22  ;;  %515 = vmatpush1.msra.mxu0 %v369_v9  ;;  %v462_v61 = vmul.f32 %v669_v57, %v343_v56 }
  0x24   : > { %395 = vmatprep.subr.mxu1 %v360_v23  ;;  %516 = vmatprep.subr.mxu0 %v368_v10 }
  0x25   : > { %396 = vmatpush1.msra.mxu1 %v359_v24  ;;  %517 = vmatpush1.msra.mxu0 %v367_v11 }
  0x26   : > { %397 = vmatprep.subr.mxu1 %v358_v25  ;;  %518 = vmatprep.subr.mxu0 %v366_v12 }
  0x27   : > { %398 = vmatpush1.msra.mxu1 %v357_v26  ;;  %519 = vmatpush1.msra.mxu0 %v365_v15 }
  0x28   : > { %399 = vmatprep.subr.mxu1 %v356_v27  ;;  %520 = vmatprep.subr.mxu0 %v364_v17 }
  0x29   : > { %400 = vmatpush1.msra.mxu1 %v355_v28  ;;  %521 = vmatpush1.msra.mxu0 %v363_v20 }
  0x2a   : > { %401 = vmatprep.subr.mxu1 %v354_v29  ;;  %522 = vmatprep.subr.mxu0 %v362_v21 }
  0x2b   : > { %402 = vmatpush1.msra.mxu1 %v353_v30  ;;  %523 = vmatpush1.msra.mxu0 %v361_v22 }
  0x2c   : > { %403 = vmatprep.subr.mxu1 %v352_v31  ;;  %524 = vmatprep.subr.mxu0 %v360_v23 }
  0x2d   : > { %404 = vmatpush1.msra.mxu1 %v351_v32  ;;  %525 = vmatpush1.msra.mxu0 %v359_v24 }
  0x2e   : > { %405 = vmatprep.subr.mxu1 %v350_v33  ;;  %526 = vmatprep.subr.mxu0 %v358_v25 }
  0x2f   : > { %406 = vmatpush1.msra.mxu1 %v349_v34  ;;  %527 = vmatpush1.msra.mxu0 %v357_v26 }
  0x30   : > { %407 = vmatprep.subr.mxu1 %v348_v35  ;;  %528 = vmatprep.subr.mxu0 %v356_v27 }
  0x31   : > { %408 = vmatpush1.msra.mxu1 %v347_v36  ;;  %330 = vmatprep.mubr.f32.mxu0 %v704_v5 }
  0x32   : > { %409 = vmatprep.subr.mxu1 %v346_v37  ;;  %529 = vmatpush1.msra.mxu0 %v355_v28 }
  0x33   : > { %410 = vmatpush1.msra.mxu1 %v345_v38  ;;  %530 = vmatprep.subr.mxu0 %v354_v29 }
  0x34   : > { %444 = vmatmul.mubr.f32.vlgmr.msra.gmra.mxu1 %v341_v39  ;;  %531 = vmatpush1.msra.mxu0 %v353_v30 }
  0x35   : > { %532 = vmatprep.subr.mxu0 %v352_v31  ;;  %667 = vmatmul.mubr.msk.f32.gmra.mxu0 %vm253_vm0, %v236_v40 }
  0x36   : > { %533 = vmatpush1.msra.mxu0 %v351_v32  ;;  %572 = vmatprep.mubr.f32.mxu0 %v704_v5 }
  0x37   : > { %534 = vmatprep.subr.mxu0 %v350_v33 }
  0x38   : > { %535 = vmatpush1.msra.mxu0 %v349_v34 }
  0x39   : > { %536 = vmatprep.subr.mxu0 %v348_v35 }
  0x3a   : > { %537 = vmatpush1.msra.mxu0 %v347_v36 }
  0x3b   : > { %538 = vmatprep.subr.mxu0 %v346_v37 }
  0x3c   : > { %539 = vmatpush1.msra.mxu0 %v345_v38 }
  0xdb   : > { %v326_v46 = vpop.f32.mrf.mxu0 }
  0xdc   : > { %v327_v47 = vadd.f32 %v326_v46, %v246_v45 }
  0xdd   : > { %v328_v55 = vpop.f32.mrf.mxu0 }
  0xde   : > { %v329_v59 = vadd.f32 %v328_v55, %v250_v54 }
  0xf4   : > { %v445_v48 = vpop.f32.mrf.mxu1 }
  0xf5   : > { %v446_v49 = vadd.f32 %v445_v48, %v327_v47  ;;  %v332_v10 = vpop.f32.mrf.mxu0 }
  0xf6   : > { %v447_v58 = vpop.f32.mrf.mxu1  ;;  %v333_v12 = vadd.f32 %v332_v10, %v246_v45 }
  0xf7   : > { %v668_v50 = vmul.f32 -1.442695, %v446_v49  ;;  %v448_v60 = vadd.f32 %v447_v58, %v329_v59  ;;  %v334_v11 = vpop.f32.mrf.mxu0 }
  0xf8   : > { %v335_v14 = vadd.f32 %v334_v11, %v250_v54 }
  0xf9   : > { %687 = vpow2.f32 %v668_v50  ;;  %v463_v0 = vadd.f32 %v462_v61, %v448_v60 }
  0xfb   : > { %v585_v19 = vmul.f32 %v669_v57, %v463_v0 }
 0x106   : > { %v688_v51 = vpop.eup %687 }
 0x107   : > { %v453_v52 = vadd.f32 1.0, %v688_v51 }
 0x109   : > { %689 = vrcp.f32 %v453_v52 }
 0x116   : > { %v690_v62 = vpop.eup %689 }
 0x117   : > { %v465_v1 = vsub.f32 1.0, %v690_v62  ;;  %v464_v2 = vmul.f32 %v690_v62, %v342_v63 }
 0x119   : > { %v466_v3 = vmul.f32 %v465_v1, %v463_v0 }
 0x11b   : > { %v467_v4 = vadd.f32 %v466_v3, %v464_v2 }
 0x11d   : > { %v468_v6 = vsub.f32 %v467_v4, %v341_v39 }
 0x11f   : > { %vm469_vm1 = vcmp.ge.f32.partialorder %v468_v6, 1.0 }
 0x120   : > { %671 = vmatmul.mubr.msk.f32.vlgmr.msra.gmra.mxu0 %vm469_vm1, %v705_v7  ;;  %v670_v8 = vsel %vm469_vm1, 1.0, %v704_v5 }
 0x121   : > { %v472_v9 = vpack.c.bf16 %v670_v8, %v670_v8 }
 0x123   : > { %473 = vst [vmem:[%s752_s28] sm:$0xf] %v472_v9 }
 0x1e0   : > { %v574_v13 = vpop.f32.mrf.mxu0 }
 0x1e1   : > { %v575_v15 = vadd.f32 %v574_v13, %v333_v12 }
 0x1e2   : > { %v576_v16 = vpop.f32.mrf.mxu0 }
 0x1e3   : > { %v672_v17 = vmul.f32 -1.442695, %v575_v15  ;;  %v577_v18 = vadd.f32 %v576_v16, %v335_v14 }
 0x1e5   : > { %691 = vpow2.f32 %v672_v17  ;;  %v586_v20 = vadd.f32 %v585_v19, %v577_v18 }
 0x1e7   : > { %599 = vst [vmem:[#allocation4] sm:$0xff] %v586_v20 }
 0x1f2   : > { %v692_v21 = vpop.eup %691 }
 0x1f3   : > { %v582_v22 = vadd.f32 1.0, %v692_v21 }
 0x1f5   : > { %693 = vrcp.f32 %v582_v22 }
 0x202   : > { %v694_v23 = vpop.eup %693 }
 0x203   : > { %v588_v24 = vsub.f32 1.0, %v694_v23  ;;  %v587_v25 = vmul.f32 %v694_v23, %v468_v6 }
 0x205   : > { %v589_v26 = vmul.f32 %v588_v24, %v586_v20 }
 0x207   : > { %v590_v27 = vadd.f32 %v589_v26, %v587_v25 }
 0x209   : > { %v591_v28 = vsub.f32 %v590_v27, %v670_v8 }
 0x20b   : > { %vm592_vm2 = vcmp.ge.f32.partialorder %v591_v28, 1.0  ;;  %598 = vst [vmem:[#allocation3] sm:$0xff] %v591_v28 }
 0x20c   : > { %v673_v29 = vsel %vm592_vm2, 1.0, %v704_v5 }
 0x20d   : > { %v595_v30 = vpack.c.bf16 %v673_v29, %v673_v29  ;;  %597 = vst [vmem:[#allocation2] sm:$0xff] %v673_v29 }
 0x20f   : > { %596 = vst [vmem:[%s752_s28 + $0x4] sm:$0xf] %v595_v30 }
 0x210 PF: > { %s15_s18 = sadd.s32 1, %s701_s18  }
 0x211   : > { %p12_p5 = scmp.ge.s32.totalorder %s15_s18, 6  }
 0x213   :  { %14 = sbr.rel (!%p12_p5) target bundleno = 1 (0x1), region = 74 }

// kernel: ligru_forward.7
= control target key start
LH: loop header
LB: loop body
LE: loop exit
PB: predicated region body
PF: predicated region fallthrough
CT: control target
= control target key end

     0   :  { %s743_s18 = smov 0   ;;  %s890_s0 = inlined_call_operand.vmem [shape: f32[64,16], index: 0, kind: input, shape index: {}]   ;;  %s891_s1 = inlined_call_operand.vmem [shape: f32[16,256], index: 1, kind: input, shape index: {}]   ;;  %s892_s2 = inlined_call_operand.vmem [shape: f32[128,256], index: 2, kind: input, shape index: {}]   ;;  %s893_s3 = inlined_call_operand.vmem [shape: f32[1,256], index: 3, kind: input, shape index: {}]   ;;  %s894_s4 = inlined_call_operand.vmem [shape: f32[1,128], index: 4, kind: input, shape index: {}]   ;;  %s895_s5 = inlined_call_operand.vmem [shape: bf16[64,128], index: 5, kind: output, shape index: {}]  }
   0x1 LB: > { %s663_s19 = sadd.s32 4294967295, %s708_s18   ;;  %p667_p0 = scmp.ge.s32.totalorder %s708_s18, 1  ;;  %s708_s18 = sphi %s743_s18, %s15_s18  }
   0x2   : > { %p192_p1 = scmp.lt.s32.totalorder %s708_s18, 5 }
   0x4   : > { %p193_p2 = pnand %p667_p0, %p192_p1 }
   0x5   : > { %s221_s20 = ssub.s32 (!%p193_p2), 3, %s663_s19  ;;  %s670_s21 = sshll.u32 (!%p193_p2), %s663_s19, 1 }
   0x6   : > { %196 = sbr.rel (%p193_p2) target bundleno = 531 (0x213), region = 40  ;;  %s668_s22 = sshll.u32 (!%p193_p2), %s221_s20, 1 }
   0x7   : > { %p230_p3 = scmp.lt.s32.totalorder (!%p193_p2), %s670_s21, 7  ;;  %p223_p4 = scmp.lt.s32.totalorder (!%p193_p2), %s668_s22, 7 }
   0x8   : > { %p672_p5 = scmp.ne.s32.totalorder (!%p193_p2), %s663_s19, 0 }
   0xb   : > { %s897_s21 = smov (!%p230_p3, %s670_s21), 7  ;;  %s899_s22 = smov (!%p223_p4, %s668_s22), 7 }
   0xc   : > { %s671_s23 = sshll.u32 %s897_s21, 2  ;;  %s669_s24 = sshll.u32 %s899_s22, 3 }
   0xd   : > { %s754_s27 = scalar_lea.vmem %s895_s5, %s671_s23  ;;  %s759_s30 = scalar_lea.vmem %s890_s0, %s669_s24 }
   0xe   : > { %238 = sbr.rel (%p672_p5) target bundleno = 22 (0x16), region = 44 }
  0x13   : > { %v710_v0 = vmov 0.0  }
  0x14   : > { %239 = vst [vmem:[#allocation2] sm:$0xff] %v710_v0  ;;  %240 = vst [vmem:[#allocation3] sm:$0xff] %v710_v0 }
  0x15   : > { %241 = vst [vmem:[#allocation4] sm:$0xff] %v710_v0 }
  0x16 PF: > { %v383_v1 = vld [vmem:[%s892_s2 + $0xf8] sm:$0xff]  ;;  %v382_v2 = vld [vmem:[%s892_s2 + $0xf0] sm:$0xff]  ;;  %v381_v3 = vld [vmem:[%s892_s2 + $0xe8] sm:$0xff]  ;;  %v711_v5 = vmov 0.0   ;;  %vm260_vm0 = vcmask 130048   ;;  %v250_v41 = vlaneseq }
  0x17   : > { %386 = vmatprep.subr.mxu1 %v383_v1  ;;  %v380_v4 = vld [vmem:[%s892_s2 + $0xe0] sm:$0xff]  ;;  %331 = vmatprep.mubr.f32.mxu0 %v711_v5  ;;  %v379_v6 = vld [vmem:[%s892_s2 + $0xd8] sm:$0xff]  ;;  %v378_v7 = vld [vmem:[%s892_s2 + $0xd0] sm:$0xff] }
  0x18   : > { %387 = vmatpush1.msra.mxu1 %v382_v2  ;;  %450 = vmatprep.mubr.f32.mxu1 %v711_v5  ;;  %v377_v8 = vld [vmem:[%s892_s2 + $0xc8] sm:$0xff]  ;;  %v376_v9 = vld [vmem:[%s892_s2 + $0xc0] sm:$0xff]  ;;  %v375_v10 = vld [vmem:[%s892_s2 + $0xb8] sm:$0xff]  ;;  %v251_v42 = vshrl.u32 %v250_v41, 7 }
  0x19   : > { %388 = vmatprep.subr.mxu1 %v381_v3  ;;  %v247_v11 = vld [vmem:[%s891_s1 + $0x18] sm:$0xff]  ;;  %v374_v12 = vld [vmem:[%s892_s2 + $0xb0] sm:$0xff]  ;;  %v373_v14 = vld [vmem:[%s892_s2 + $0xa8] sm:$0xff] }
  0x1a   : > { %389 = vmatpush1.msra.mxu1 %v380_v4  ;;  %295 = vmatprep.subr.mxu0 %v247_v11  ;;  %v246_v13 = vld [vmem:[%s891_s1 + $0x10] sm:$0xff]  ;;  %v245_v15 = vld [vmem:[%s891_s1 + $0x8] sm:$0xff]  ;;  %v244_v16 = vld [vmem:[%s891_s1] sm:$0xff]  ;;  %v252_v43 = vsub.s32 0, %v251_v42  ;;  %v256_v45 = vsub.s32 1, %v251_v42  ;;  %v712_v11 = vmov 1.0  }
  0x1b   : > { %390 = vmatprep.subr.mxu1 %v379_v6  ;;  %296 = vmatpush1.msra.mxu0 %v246_v13  ;;  %v372_v17 = vld [vmem:[%s892_s2 + $0xa0] sm:$0xff]  ;;  %v371_v19 = vld [vmem:[%s892_s2 + $0x98] sm:$0xff]  ;;  %v370_v20 = vld [vmem:[%s892_s2 + $0x90] sm:$0xff] }
  0x1c   : > { %391 = vmatpush1.msra.mxu1 %v378_v7  ;;  %297 = vmatprep.subr.mxu0 %v245_v15  ;;  %v242_v18 = vld [vmem:[%s759_s30] sm:$0xff]  ;;  %v369_v21 = vld [vmem:[%s892_s2 + $0x88] sm:$0xff]  ;;  %v367_v24 = vld [vmem:[%s892_s2 + $0x78] sm:$0xff] }
  0x1d   : > { %392 = vmatprep.subr.mxu1 %v377_v8  ;;  %298 = vmatpush1.msra.mxu0 %v244_v16  ;;  %v243_v22 = vld [vmem:[%s759_s30 + $0x8] sm:$0xff]  ;;  %v368_v23 = vld [vmem:[%s892_s2 + $0x80] sm:$0xff]  ;;  %v366_v25 = vld [vmem:[%s892_s2 + $0x70] sm:$0xff] }
  0x1e   : > { %393 = vmatpush1.msra.mxu1 %v376_v9  ;;  %673 = vmatmul.mubr.msk.f32.vlgmr.msra.gmra.mxu0 %vm260_vm0, %v242_v18  ;;  %v365_v26 = vld [vmem:[%s892_s2 + $0x68] sm:$0xff]  ;;  %v364_v27 = vld [vmem:[%s892_s2 + $0x60] sm:$0xff]  ;;  %v363_v28 = vld [vmem:[%s892_s2 + $0x58] sm:$0xff] }
  0x1f   : > { %394 = vmatprep.subr.mxu1 %v375_v10  ;;  %337 = vmatprep.mubr.f32.mxu0 %v711_v5  ;;  %v362_v29 = vld [vmem:[%s892_s2 + $0x50] sm:$0xff]  ;;  %v361_v30 = vld [vmem:[%s892_s2 + $0x48] sm:$0xff]  ;;  %v360_v31 = vld [vmem:[%s892_s2 + $0x40] sm:$0xff] }
  0x20   : > { %395 = vmatpush1.msra.mxu1 %v374_v12  ;;  %515 = vmatprep.subr.mxu0 %v383_v1  ;;  %v359_v32 = vld [vmem:[%s892_s2 + $0x38] sm:$0xff]  ;;  %v358_v33 = vld [vmem:[%s892_s2 + $0x30] sm:$0xff]  ;;  %v357_v34 = vld [vmem:[%s892_s2 + $0x28] sm:$0xff] }
  0x21   : > { %396 = vmatprep.subr.mxu1 %v373_v14  ;;  %516 = vmatpush1.msra.mxu0 %v382_v2  ;;  %v356_v35 = vld [vmem:[%s892_s2 + $0x20] sm:$0xff]  ;;  %v355_v36 = vld [vmem:[%s892_s2 + $0x18] sm:$0xff]  ;;  %v354_v37 = vld [vmem:[%s892_s2 + $0x10] sm:$0xff] }
  0x22   : > { %397 = vmatpush1.msra.mxu1 %v372_v17  ;;  %674 = vmatmul.mubr.msk.f32.gmra.mxu0 %vm260_vm0, %v243_v22  ;;  %v353_v38 = vld [vmem:[%s892_s2 + $0x8] sm:$0xff]  ;;  %v352_v39 = vld [vmem:[%s892_s2] sm:$0xff]  ;;  %v350_v60 = vld [vmem:[#allocation4] sm:$0xff] }
  0x23   : > { %398 = vmatprep.subr.mxu1 %v371_v19  ;;  %517 = vmatprep.subr.mxu0 %v381_v3  ;;  %v348_v40 = vld [vmem:[#allocation2] sm:$0xff]  ;;  %v349_v3 = vld [vmem:[#allocation3] sm:$0xff] }
  0x24   : > { %399 = vmatpush1.msra.mxu1 %v370_v20  ;;  %518 = vmatpush1.msra.mxu0 %v380_v4  ;;  %v248_v44 = vld [vmem:[%s893_s3] sm:$0x3] }
  0x25   : > { %400 = vmatprep.subr.mxu1 %v369_v21  ;;  %519 = vmatprep.subr.mxu0 %v379_v6  ;;  %v253_v46 = vrot.slane %v248_v44, %v252_v43  ;;  %v257_v47 = vrot.slane %v248_v44, %v256_v45  ;;  %v676_v61 = vld [vmem:[%s894_s4] ss:$0 sm:$0xff] }
  0x26   : > { %401 = vmatpush1.msra.mxu1 %v368_v23  ;;  %520 = vmatpush1.msra.mxu0 %v378_v7  ;;  %v469_v1 = vmul.f32 %v676_v61, %v350_v60 }
  0x27   : > { %402 = vmatprep.subr.mxu1 %v367_v24  ;;  %521 = vmatprep.subr.mxu0 %v377_v8 }
  0x28   : > { %403 = vmatpush1.msra.mxu1 %v366_v25  ;;  %522 = vmatpush1.msra.mxu0 %v376_v9 }
  0x29   : > { %404 = vmatprep.subr.mxu1 %v365_v26  ;;  %523 = vmatprep.subr.mxu0 %v375_v10 }
  0x2a   : > { %405 = vmatpush1.msra.mxu1 %v364_v27  ;;  %524 = vmatpush1.msra.mxu0 %v374_v12 }
  0x2b   : > { %406 = vmatprep.subr.mxu1 %v363_v28  ;;  %525 = vmatprep.subr.mxu0 %v373_v14 }
  0x2c   : > { %407 = vmatpush1.msra.mxu1 %v362_v29  ;;  %526 = vmatpush1.msra.mxu0 %v372_v17 }
  0x2d   : > { %408 = vmatprep.subr.mxu1 %v361_v30  ;;  %527 = vmatprep.subr.mxu0 %v371_v19 }
  0x2e   : > { %409 = vmatpush1.msra.mxu1 %v360_v31  ;;  %528 = vmatpush1.msra.mxu0 %v370_v20 }
  0x2f   : > { %410 = vmatprep.subr.mxu1 %v359_v32  ;;  %529 = vmatprep.subr.mxu0 %v369_v21 }
  0x30   : > { %411 = vmatpush1.msra.mxu1 %v358_v33  ;;  %530 = vmatpush1.msra.mxu0 %v368_v23 }
  0x31   : > { %412 = vmatprep.subr.mxu1 %v357_v34  ;;  %531 = vmatprep.subr.mxu0 %v367_v24 }
  0x32   : > { %413 = vmatpush1.msra.mxu1 %v356_v35  ;;  %532 = vmatpush1.msra.mxu0 %v366_v25 }
  0x33   : > { %414 = vmatprep.subr.mxu1 %v355_v36  ;;  %533 = vmatprep.subr.mxu0 %v365_v26 }
  0x34   : > { %415 = vmatpush1.msra.mxu1 %v354_v37  ;;  %534 = vmatpush1.msra.mxu0 %v364_v27 }
  0x35   : > { %416 = vmatprep.subr.mxu1 %v353_v38  ;;  %535 = vmatprep.subr.mxu0 %v363_v28 }
  0x36   : > { %417 = vmatpush1.msra.mxu1 %v352_v39  ;;  %579 = vmatprep.mubr.f32.mxu0 %v711_v5 }
  0x37   : > { %451 = vmatmul.mubr.f32.vlgmr.msra.gmra.mxu1 %v348_v40  ;;  %536 = vmatpush1.msra.mxu0 %v362_v29 }
  0x38   : > { %537 = vmatprep.subr.mxu0 %v361_v30 }
  0x39   : > { %538 = vmatpush1.msra.mxu0 %v360_v31 }
  0x3a   : > { %539 = vmatprep.subr.mxu0 %v359_v32 }
  0x3b   : > { %540 = vmatpush1.msra.mxu0 %v358_v33 }
  0x3c   : > { %541 = vmatprep.subr.mxu0 %v357_v34 }
  0x3d   : > { %542 = vmatpush1.msra.mxu0 %v356_v35 }
  0x3e   : > { %543 = vmatprep.subr.mxu0 %v355_v36 }
  0x3f   : > { %544 = vmatpush1.msra.mxu0 %v354_v37 }
  0x40   : > { %545 = vmatprep.subr.mxu0 %v353_v38 }
  0x41   : > { %546 = vmatpush1.msra.mxu0 %v352_v39 }
  0xde   : > { %v333_v48 = vpop.f32.mrf.mxu0 }
  0xdf   : > { %v334_v49 = vadd.f32 %v333_v48, %v253_v46 }
  0xe0   : > { %v335_v50 = vpop.f32.mrf.mxu0 }
  0xe1   : > { %v336_v51 = vadd.f32 %v335_v50, %v257_v47 }
  0xe2   : > { %v339_v52 = vpop.f32.mrf.mxu0 }
  0xe3   : > { %v340_v53 = vadd.f32 %v339_v52, %v253_v46 }
  0xe4   : > { %v341_v59 = vpop.f32.mrf.mxu0 }
  0xe5   : > { %v342_v63 = vadd.f32 %v341_v59, %v257_v47 }
  0xf7   : > { %v452_v54 = vpop.f32.mrf.mxu1 }
  0xf8   : > { %v453_v55 = vadd.f32 %v452_v54, %v340_v53 }
  0xf9   : > { %v454_v62 = vpop.f32.mrf.mxu1 }
  0xfa   : > { %v675_v56 = vmul.f32 -1.442695, %v453_v55  ;;  %v455_v0 = vadd.f32 %v454_v62, %v342_v63 }
  0xfc   : > { %694 = vpow2.f32 %v675_v56  ;;  %v470_v4 = vadd.f32 %v469_v1, %v455_v0 }
  0xfe   : > { %v592_v19 = vmul.f32 %v676_v61, %v470_v4 }
 0x109   : > { %v695_v57 = vpop.eup %694 }
 0x10a   : > { %v460_v58 = vadd.f32 1.0, %v695_v57 }
 0x10c   : > { %696 = vrcp.f32 %v460_v58 }
 0x119   : > { %v697_v2 = vpop.eup %696 }
 0x11a   : > { %v472_v6 = vsub.f32 1.0, %v697_v2  ;;  %v471_v7 = vmul.f32 %v697_v2, %v349_v3 }
 0x11c   : > { %v473_v8 = vmul.f32 %v472_v6, %v470_v4 }
 0x11e   : > { %v474_v9 = vadd.f32 %v473_v8, %v471_v7 }
 0x120   : > { %v475_v10 = vsub.f32 %v474_v9, %v348_v40 }
 0x122   : > { %vm476_vm1 = vcmp.ge.f32.partialorder %v475_v10, 1.0 }
 0x123   : > { %678 = vmatmul.mubr.msk.f32.vlgmr.msra.gmra.mxu0 %vm476_vm1, %v712_v11  ;;  %v677_v12 = vsel %vm476_vm1, 1.0, %v711_v5 }
 0x124   : > { %v479_v13 = vpack.c.bf16 %v677_v12, %v677_v12 }
 0x126   : > { %480 = vst [vmem:[%s754_s27] sm:$0xf] %v479_v13 }
 0x1e3   : > { %v581_v14 = vpop.f32.mrf.mxu0 }
 0x1e4   : > { %v582_v15 = vadd.f32 %v581_v14, %v334_v49 }
 0x1e5   : > { %v583_v16 = vpop.f32.mrf.mxu0 }
 0x1e6   : > { %v679_v17 = vmul.f32 -1.442695, %v582_v15  ;;  %v584_v18 = vadd.f32 %v583_v16, %v336_v51 }
 0x1e8   : > { %698 = vpow2.f32 %v679_v17  ;;  %v593_v20 = vadd.f32 %v592_v19, %v584_v18 }
 0x1ea   : > { %606 = vst [vmem:[#allocation4] sm:$0xff] %v593_v20 }
 0x1f5   : > { %v699_v21 = vpop.eup %698 }
 0x1f6   : > { %v589_v22 = vadd.f32 1.0, %v699_v21 }
 0x1f8   : > { %700 = vrcp.f32 %v589_v22 }
 0x205   : > { %v701_v23 = vpop.eup %700 }
 0x206   : > { %v595_v24 = vsub.f32 1.0, %v701_v23  ;;  %v594_v25 = vmul.f32 %v701_v23, %v475_v10 }
 0x208   : > { %v596_v26 = vmul.f32 %v595_v24, %v593_v20 }
 0x20a   : > { %v597_v27 = vadd.f32 %v596_v26, %v594_v25 }
 0x20c   : > { %v598_v28 = vsub.f32 %v597_v27, %v677_v12 }
 0x20e   : > { %vm599_vm2 = vcmp.ge.f32.partialorder %v598_v28, 1.0  ;;  %605 = vst [vmem:[#allocation3] sm:$0xff] %v598_v28 }
 0x20f   : > { %v680_v29 = vsel %vm599_vm2, 1.0, %v711_v5 }
 0x210   : > { %v602_v30 = vpack.c.bf16 %v680_v29, %v680_v29  ;;  %604 = vst [vmem:[#allocation2] sm:$0xff] %v680_v29 }
 0x212   : > { %603 = vst [vmem:[%s754_s27 + $0x4] sm:$0xf] %v602_v30 }
 0x213 PF: > { %s15_s18 = sadd.s32 1, %s708_s18  }
 0x214   : > { %p12_p6 = scmp.ge.s32.totalorder %s15_s18, 6  }
 0x216   :  { %14 = sbr.rel (!%p12_p6) target bundleno = 1 (0x1), region = 74 }

// kernel: ligru_forward.9
= control target key start
LH: loop header
LB: loop body
LE: loop exit
PB: predicated region body
PF: predicated region fallthrough
CT: control target
= control target key end

     0   :  { %s997_s24 = smov 0   ;;  %s1373_s0 = inlined_call_operand.vmem [shape: bf16[64,128], index: 0, kind: input, shape index: {}]   ;;  %s1374_s1 = inlined_call_operand.vmem [shape: bf16[64,128], index: 1, kind: input, shape index: {}]   ;;  %s1375_s2 = inlined_call_operand.vmem [shape: f32[128,256], index: 2, kind: input, shape index: {}]   ;;  %s1376_s3 = inlined_call_operand.vmem [shape: f32[128,256], index: 3, kind: input, shape index: {}]   ;;  %s1377_s4 = inlined_call_operand.vmem [shape: f32[128,256], index: 4, kind: input, shape index: {}]   ;;  %s1378_s5 = inlined_call_operand.vmem [shape: f32[1,256], index: 5, kind: input, shape index: {}]   ;;  %s1379_s6 = inlined_call_operand.vmem [shape: f32[1,128], index: 6, kind: input, shape index: {}]   ;;  %s1380_s7 = inlined_call_operand.vmem [shape: bf16[64,128], index: 7, kind: output, shape index: {}]  }
   0x1 LB: > { %s899_s25 = sadd.s32 4294967295, %s952_s24   ;;  %p903_p0 = scmp.ge.s32.totalorder %s952_s24, 1  ;;  %s952_s24 = sphi %s997_s24, %s17_s24  }
   0x2   : > { %p253_p1 = scmp.lt.s32.totalorder %s952_s24, 5 }
   0x4   : > { %p254_p2 = pnand %p903_p0, %p253_p1 }
   0x5   : > { %s904_s26 = sshll.u32 (!%p254_p2), %s899_s25, 1  ;;  %s297_s27 = ssub.s32 (!%p254_p2), 3, %s899_s25 }
   0x6   : > { %257 = sbr.rel (%p254_p2) target bundleno = 567 (0x237), region = 48  ;;  %p292_p3 = scmp.lt.s32.totalorder (!%p254_p2), %s904_s26, 7 }
   0x7   : > { %s906_s28 = sshll.u32 (!%p254_p2), %s297_s27, 1  ;;  %p910_p5 = scmp.ne.s32.totalorder (!%p254_p2), %s899_s25, 0 }
   0x8   : > { %p299_p4 = scmp.lt.s32.totalorder (!%p254_p2), %s906_s28, 7 }
   0xb   : > { %s1382_s26 = smov (!%p292_p3, %s904_s26), 7  ;;  %s1384_s28 = smov (!%p299_p4, %s906_s28), 7 }
   0xc   : > { %s905_s29 = sshll.u32 %s1382_s26, 2  ;;  %s907_s10 = sshll.u32 %s1384_s28, 2 }
   0xd   : > { %s1008_s9 = scalar_lea.vmem %s1373_s0, %s905_s29  ;;  %s1013_s13 = scalar_lea.vmem %s1374_s1, %s907_s10 }
   0xe   : > { %s1018_s16 = scalar_lea.vmem %s1380_s7, %s905_s29  ;;  %314 = sbr.rel (%p910_p5) target bundleno = 22 (0x16), region = 52 }
  0x13   : > { %v954_v0 = vmov 0.0  }
  0x14   : > { %315 = vst [vmem:[#allocation2] sm:$0xff] %v954_v0  ;;  %316 = vst [vmem:[#allocation3] sm:$0xff] %v954_v0 }
  0x15   : > { %317 = vst [vmem:[#allocation4] sm:$0xff] %v954_v0 }
  0x16 PF: > { %v353_v1 = vld [vmem:[%s1375_s2 + $0xf8] sm:$0xff]  ;;  %v352_v2 = vld [vmem:[%s1375_s2 + $0xf0] sm:$0xff]  ;;  %v351_v3 = vld [vmem:[%s1375_s2 + $0xe8] sm:$0xff]  ;;  %v955_v5 = vmov 0.0  }
  0x17   : > { %366 = vmatprep.subr.mxu0 %v353_v1  ;;  %v350_v4 = vld [vmem:[%s1375_s2 + $0xe0] sm:$0xff]  ;;  %430 = vmatprep.mubr.f32.mxu0 %v955_v5  ;;  %v349_v6 = vld [vmem:[%s1375_s2 + $0xd8] sm:$0xff]  ;;  %v348_v7 = vld [vmem:[%s1375_s2 + $0xd0] sm:$0xff] }
  0x18   : > { %367 = vmatpush1.msra.mxu0 %v352_v2  ;;  %547 = vmatprep.mubr.f32.mxu1 %v955_v5  ;;  %v347_v8 = vld [vmem:[%s1375_s2 + $0xc8] sm:$0xff]  ;;  %v346_v9 = vld [vmem:[%s1375_s2 + $0xc0] sm:$0xff]  ;;  %v345_v10 = vld [vmem:[%s1375_s2 + $0xb8] sm:$0xff] }
  0x19   : > { %368 = vmatprep.subr.mxu0 %v351_v3  ;;  %v344_v11 = vld [vmem:[%s1375_s2 + $0xb0] sm:$0xff]  ;;  %v343_v12 = vld [vmem:[%s1375_s2 + $0xa8] sm:$0xff]  ;;  %v342_v13 = vld [vmem:[%s1375_s2 + $0xa0] sm:$0xff] }
  0x1a   : > { %369 = vmatpush1.msra.mxu0 %v350_v4  ;;  %v482_v14 = vld [vmem:[%s1376_s3 + $0xf8] sm:$0xff]  ;;  %v481_v16 = vld [vmem:[%s1376_s3 + $0xf0] sm:$0xff]  ;;  %v480_v18 = vld [vmem:[%s1376_s3 + $0xe8] sm:$0xff] }
  0x1b   : > { %370 = vmatprep.subr.mxu0 %v349_v6  ;;  %v341_v15 = vld [vmem:[%s1375_s2 + $0x98] sm:$0xff]  ;;  %483 = vmatprep.subr.mxu1 %v482_v14  ;;  %v340_v17 = vld [vmem:[%s1375_s2 + $0x90] sm:$0xff]  ;;  %v479_v19 = vld [vmem:[%s1376_s3 + $0xe0] sm:$0xff] }
  0x1c   : > { %371 = vmatpush1.msra.mxu0 %v348_v7  ;;  %484 = vmatpush1.msra.mxu1 %v481_v16  ;;  %v339_v20 = vld [vmem:[%s1375_s2 + $0x88] sm:$0xff]  ;;  %v478_v21 = vld [vmem:[%s1376_s3 + $0xd8] sm:$0xff]  ;;  %v338_v22 = vld [vmem:[%s1375_s2 + $0x80] sm:$0xff] }
  0x1d   : > { %372 = vmatprep.subr.mxu0 %v347_v8  ;;  %485 = vmatprep.subr.mxu1 %v480_v18  ;;  %v477_v23 = vld [vmem:[%s1376_s3 + $0xd0] sm:$0xff]  ;;  %v476_v24 = vld [vmem:[%s1376_s3 + $0xc8] sm:$0xff]  ;;  %v337_v25 = vld [vmem:[%s1375_s2 + $0x78] sm:$0xff] }
  0x1e   : > { %373 = vmatpush1.msra.mxu0 %v346_v9  ;;  %486 = vmatpush1.msra.mxu1 %v479_v19  ;;  %v475_v26 = vld [vmem:[%s1376_s3 + $0xc0] sm:$0xff]  ;;  %v336_v27 = vld [vmem:[%s1375_s2 + $0x70] sm:$0xff]  ;;  %v474_v28 = vld [vmem:[%s1376_s3 + $0xb8] sm:$0xff] }
  0x1f   : > { %374 = vmatprep.subr.mxu0 %v345_v10  ;;  %487 = vmatprep.subr.mxu1 %v478_v21  ;;  %v335_v29 = vld [vmem:[%s1375_s2 + $0x68] sm:$0xff]  ;;  %v473_v30 = vld [vmem:[%s1376_s3 + $0xb0] sm:$0xff]  ;;  %v334_v31 = vld [vmem:[%s1375_s2 + $0x60] sm:$0xff] }
  0x20   : > { %375 = vmatpush1.msra.mxu0 %v344_v11  ;;  %488 = vmatpush1.msra.mxu1 %v477_v23  ;;  %v472_v32 = vld [vmem:[%s1376_s3 + $0xa8] sm:$0xff]  ;;  %v333_v33 = vld [vmem:[%s1375_s2 + $0x58] sm:$0xff]  ;;  %v471_v34 = vld [vmem:[%s1376_s3 + $0xa0] sm:$0xff] }
  0x21   : > { %376 = vmatprep.subr.mxu0 %v343_v12  ;;  %489 = vmatprep.subr.mxu1 %v476_v24  ;;  %v332_v35 = vld [vmem:[%s1375_s2 + $0x50] sm:$0xff]  ;;  %v470_v36 = vld [vmem:[%s1376_s3 + $0x98] sm:$0xff]  ;;  %v331_v37 = vld [vmem:[%s1375_s2 + $0x48] sm:$0xff] }
  0x22   : > { %377 = vmatpush1.msra.mxu0 %v342_v13  ;;  %490 = vmatpush1.msra.mxu1 %v475_v26  ;;  %v469_v38 = vld [vmem:[%s1376_s3 + $0x90] sm:$0xff]  ;;  %v330_v39 = vld [vmem:[%s1375_s2 + $0x40] sm:$0xff]  ;;  %v468_v40 = vld [vmem:[%s1376_s3 + $0x88] sm:$0xff] }
  0x23   : > { %378 = vmatprep.subr.mxu0 %v341_v15  ;;  %491 = vmatprep.subr.mxu1 %v474_v28  ;;  %v329_v41 = vld [vmem:[%s1375_s2 + $0x38] sm:$0xff]  ;;  %v467_v42 = vld [vmem:[%s1376_s3 + $0x80] sm:$0xff]  ;;  %v328_v43 = vld [vmem:[%s1375_s2 + $0x30] sm:$0xff] }
  0x24   : > { %379 = vmatpush1.msra.mxu0 %v340_v17  ;;  %492 = vmatpush1.msra.mxu1 %v473_v30  ;;  %v466_v44 = vld [vmem:[%s1376_s3 + $0x78] sm:$0xff]  ;;  %v327_v45 = vld [vmem:[%s1375_s2 + $0x28] sm:$0xff]  ;;  %v465_v46 = vld [vmem:[%s1376_s3 + $0x70] sm:$0xff] }
  0x25   : > { %380 = vmatprep.subr.mxu0 %v339_v20  ;;  %493 = vmatprep.subr.mxu1 %v472_v32  ;;  %v326_v47 = vld [vmem:[%s1375_s2 + $0x20] sm:$0xff]  ;;  %v464_v48 = vld [vmem:[%s1376_s3 + $0x68] sm:$0xff]  ;;  %v325_v49 = vld [vmem:[%s1375_s2 + $0x18] sm:$0xff] }
  0x26   : > { %381 = vmatpush1.msra.mxu0 %v338_v22  ;;  %494 = vmatpush1.msra.mxu1 %v471_v34  ;;  %v1167_v50 = vld [vmem:[%s1008_s9] sm:$0xff]   ;;  %v324_v52 = vld [vmem:[%s1375_s2 + $0x10] sm:$0xff]  ;;  %v462_v53 = vld [vmem:[%s1376_s3 + $0x58] sm:$0xff] }
  0x27   : > { %382 = vmatprep.subr.mxu0 %v337_v25  ;;  %495 = vmatprep.subr.mxu1 %v470_v36  ;;  %v463_v51 = vld [vmem:[%s1376_s3 + $0x60] sm:$0xff]  ;;  %v323_v54 = vld [vmem:[%s1375_s2 + $0x8] sm:$0xff]  ;;  %v461_v55 = vld [vmem:[%s1376_s3 + $0x50] sm:$0xff]  ;;  %v921_v57 = vunpack.c.l.bf16 %v1167_v50  ;;  %v922_v14 = vunpack.c.h.bf16 %v1167_v50 }
  0x28   : > { %383 = vmatpush1.msra.mxu0 %v336_v27  ;;  %496 = vmatpush1.msra.mxu1 %v469_v38  ;;  %v322_v56 = vld [vmem:[%s1375_s2] sm:$0xff]  ;;  %v460_v58 = vld [vmem:[%s1376_s3 + $0x48] sm:$0xff]  ;;  %v1194_v59 = vld [vmem:[%s1377_s4 + $0xf8] sm:$0xff] }
  0x29   : > { %384 = vmatprep.subr.mxu0 %v335_v29  ;;  %497 = vmatprep.subr.mxu1 %v468_v40  ;;  %v1199_v60 = vld [vmem:[%s1377_s4 + $0xf0] sm:$0xff]  ;;  %v459_v61 = vld [vmem:[%s1376_s3 + $0x40] sm:$0xff]  ;;  %v1207_v62 = vld [vmem:[%s1377_s4 + $0xe8] sm:$0xff] }
  0x2a   : > { %385 = vmatpush1.msra.mxu0 %v334_v31  ;;  %498 = vmatpush1.msra.mxu1 %v467_v42  ;;  %v458_v63 = vld [vmem:[%s1376_s3 + $0x38] sm:$0xff]  ;;  %v1216_v0 = vld [vmem:[%s1377_s4 + $0xe0] sm:$0xff]  ;;  %v457_v1 = vld [vmem:[%s1376_s3 + $0x30] sm:$0xff]  ;;  %v356_v42 = vlaneseq }
  0x2b   : > { %386 = vmatprep.subr.mxu0 %v333_v33  ;;  %499 = vmatprep.subr.mxu1 %v466_v44  ;;  %v1225_v2 = vld [vmem:[%s1377_s4 + $0xd8] sm:$0xff]  ;;  %v456_v3 = vld [vmem:[%s1376_s3 + $0x28] sm:$0xff]  ;;  %v1234_v4 = vld [vmem:[%s1377_s4 + $0xd0] sm:$0xff] }
  0x2c   : > { %387 = vmatpush1.msra.mxu0 %v332_v35  ;;  %500 = vmatpush1.msra.mxu1 %v465_v46  ;;  %v455_v6 = vld [vmem:[%s1376_s3 + $0x20] sm:$0xff]  ;;  %v1243_v7 = vld [vmem:[%s1377_s4 + $0xc8] sm:$0xff]  ;;  %v454_v8 = vld [vmem:[%s1376_s3 + $0x18] sm:$0xff] }
  0x2d   : > { %388 = vmatprep.subr.mxu0 %v331_v37  ;;  %501 = vmatprep.subr.mxu1 %v464_v48  ;;  %v1252_v9 = vld [vmem:[%s1377_s4 + $0xc0] sm:$0xff]  ;;  %v1258_v10 = vld [vmem:[%s1377_s4 + $0xb8] sm:$0xff]  ;;  %v453_v11 = vld [vmem:[%s1376_s3 + $0x10] sm:$0xff] }
  0x2e   : > { %389 = vmatpush1.msra.mxu0 %v330_v39  ;;  %502 = vmatpush1.msra.mxu1 %v463_v51  ;;  %v924_v12 = vld [vmem:[%s1013_s13] sm:$0xff]   ;;  %v590_v13 = vld [vmem:[%s1377_s4 + $0xb0] sm:$0xff]  ;;  %v452_v15 = vld [vmem:[%s1376_s3 + $0x8] sm:$0xff] }
  0x2f   : > { %390 = vmatprep.subr.mxu0 %v329_v41  ;;  %503 = vmatprep.subr.mxu1 %v462_v53  ;;  %v589_v16 = vld [vmem:[%s1377_s4 + $0xa8] sm:$0xff]  ;;  %v588_v17 = vld [vmem:[%s1377_s4 + $0xa0] sm:$0xff]  ;;  %v925_v19 = vunpack.c.l.bf16 %v924_v12  ;;  %v587_v20 = vld [vmem:[%s1377_s4 + $0x98] sm:$0xff]  ;;  %v926_v24 = vunpack.c.h.bf16 %v924_v12 }
  0x30   : > { %391 = vmatpush1.msra.mxu0 %v328_v43  ;;  %504 = vmatpush1.msra.mxu1 %v461_v55  ;;  %v451_v18 = vld [vmem:[%s1376_s3] sm:$0xff]  ;;  %v586_v21 = vld [vmem:[%s1377_s4 + $0x90] sm:$0xff]  ;;  %v585_v22 = vld [vmem:[%s1377_s4 + $0x88] sm:$0xff]  ;;  %v357_v43 = vshrl.u32 %v356_v42, 7 }
  0x31   : > { %392 = vmatprep.subr.mxu0 %v327_v45  ;;  %505 = vmatprep.subr.mxu1 %v460_v58  ;;  %v584_v23 = vld [vmem:[%s1377_s4 + $0x80] sm:$0xff]  ;;  %v583_v25 = vld [vmem:[%s1377_s4 + $0x78] sm:$0xff]  ;;  %v582_v26 = vld [vmem:[%s1377_s4 + $0x70] sm:$0xff] }
  0x32   : > { %393 = vmatpush1.msra.mxu0 %v326_v47  ;;  %506 = vmatpush1.msra.mxu1 %v459_v61  ;;  %v581_v27 = vld [vmem:[%s1377_s4 + $0x68] sm:$0xff]  ;;  %v580_v28 = vld [vmem:[%s1377_s4 + $0x60] sm:$0xff]  ;;  %v579_v29 = vld [vmem:[%s1377_s4 + $0x58] sm:$0xff]  ;;  %v358_v45 = vsub.s32 0, %v357_v43  ;;  %v362_v47 = vsub.s32 1, %v357_v43 }
  0x33   : > { %394 = vmatprep.subr.mxu0 %v325_v49  ;;  %507 = vmatprep.subr.mxu1 %v458_v63  ;;  %v578_v30 = vld [vmem:[%s1377_s4 + $0x50] sm:$0xff]  ;;  %v577_v31 = vld [vmem:[%s1377_s4 + $0x48] sm:$0xff]  ;;  %v576_v32 = vld [vmem:[%s1377_s4 + $0x40] sm:$0xff] }
  0x34   : > { %395 = vmatpush1.msra.mxu0 %v324_v52  ;;  %508 = vmatpush1.msra.mxu1 %v457_v1  ;;  %v575_v33 = vld [vmem:[%s1377_s4 + $0x38] sm:$0xff]  ;;  %v574_v34 = vld [vmem:[%s1377_s4 + $0x30] sm:$0xff]  ;;  %v573_v35 = vld [vmem:[%s1377_s4 + $0x28] sm:$0xff] }
  0x35   : > { %396 = vmatprep.subr.mxu0 %v323_v54  ;;  %509 = vmatprep.subr.mxu1 %v456_v3  ;;  %v572_v36 = vld [vmem:[%s1377_s4 + $0x20] sm:$0xff]  ;;  %v571_v37 = vld [vmem:[%s1377_s4 + $0x18] sm:$0xff]  ;;  %v570_v38 = vld [vmem:[%s1377_s4 + $0x10] sm:$0xff] }
  0x36   : > { %397 = vmatpush1.msra.mxu0 %v322_v56  ;;  %510 = vmatpush1.msra.mxu1 %v455_v6  ;;  %v569_v39 = vld [vmem:[%s1377_s4 + $0x8] sm:$0xff]  ;;  %v568_v40 = vld [vmem:[%s1377_s4] sm:$0xff] }
  0x37   : > { %431 = vmatmul.mubr.f32.vlgmr.msra.gmra.mxu0 %v921_v57  ;;  %602 = vmatprep.subr.mxu0 %v1194_v59  ;;  %v1355_v41 = vld [vmem:[#allocation2] sm:$0xff] }
  0x38   : > { %603 = vmatpush1.msra.mxu0 %v1199_v60  ;;  %511 = vmatprep.subr.mxu1 %v454_v8  ;;  %v354_v46 = vld [vmem:[%s1378_s5] sm:$0x3] }
  0x39   : > { %604 = vmatprep.subr.mxu0 %v1207_v62  ;;  %436 = vmatprep.mubr.f32.mxu0 %v955_v5  ;;  %v359_v49 = vrot.slane %v354_v46, %v358_v45  ;;  %v363_v51 = vrot.slane %v354_v46, %v362_v47  ;;  %v912_v6 = vld [vmem:[%s1379_s6] ss:$0 sm:$0xff] }
  0x3a   : > { %605 = vmatpush1.msra.mxu0 %v1216_v0  ;;  %512 = vmatpush1.msra.mxu1 %v453_v11  ;;  %v565_v11 = vld [vmem:[#allocation3] sm:$0xff] }
  0x3b   : > { %606 = vmatprep.subr.mxu0 %v1225_v2  ;;  %513 = vmatprep.subr.mxu1 %v452_v15 }
  0x3c   : > { %607 = vmatpush1.msra.mxu0 %v1234_v4  ;;  %514 = vmatpush1.msra.mxu1 %v451_v18 }
  0x3d   : > { %608 = vmatprep.subr.mxu0 %v1243_v7  ;;  %437 = vmatmul.mubr.f32.gmra.mxu0 %v922_v14 }
  0x3e   : > { %609 = vmatpush1.msra.mxu0 %v1252_v9  ;;  %548 = vmatmul.mubr.f32.vlgmr.msra.gmra.mxu1 %v925_v19  ;;  %v956_v19 = vmov 1.0  }
  0x3f   : > { %610 = vmatprep.subr.mxu0 %v1258_v10  ;;  %553 = vmatprep.mubr.f32.mxu1 %v955_v5 }
  0x40   : > { %611 = vmatpush1.msra.mxu0 %v590_v13  ;;  %666 = vmatprep.mubr.f32.mxu0 %v955_v5 }
  0x41   : > { %612 = vmatprep.subr.mxu0 %v589_v16  ;;  %735 = vmatprep.subr.mxu1 %v1194_v59 }
  0x42   : > { %613 = vmatpush1.msra.mxu0 %v588_v17  ;;  %554 = vmatmul.mubr.f32.gmra.mxu1 %v926_v24 }
  0x43   : > { %614 = vmatprep.subr.mxu0 %v587_v20  ;;  %736 = vmatpush1.msra.mxu1 %v1199_v60 }
  0x44   : > { %615 = vmatpush1.msra.mxu0 %v586_v21  ;;  %737 = vmatprep.subr.mxu1 %v1207_v62 }
  0x45   : > { %616 = vmatprep.subr.mxu0 %v585_v22  ;;  %738 = vmatpush1.msra.mxu1 %v1216_v0 }
  0x46   : > { %617 = vmatpush1.msra.mxu0 %v584_v23  ;;  %739 = vmatprep.subr.mxu1 %v1225_v2 }
  0x47   : > { %618 = vmatprep.subr.mxu0 %v583_v25  ;;  %740 = vmatpush1.msra.mxu1 %v1234_v4  ;;  %v566_v4 = vld [vmem:[#allocation4] sm:$0xff] }
  0x48   : > { %619 = vmatpush1.msra.mxu0 %v582_v26  ;;  %741 = vmatprep.subr.mxu1 %v1243_v7 }
  0x49   : > { %620 = vmatprep.subr.mxu0 %v581_v27  ;;  %742 = vmatpush1.msra.mxu1 %v1252_v9  ;;  %v689_v9 = vmul.f32 %v912_v6, %v566_v4 }
  0x4a   : > { %621 = vmatpush1.msra.mxu0 %v580_v28  ;;  %743 = vmatprep.subr.mxu1 %v1258_v10 }
  0x4b   : > { %622 = vmatprep.subr.mxu0 %v579_v29  ;;  %744 = vmatpush1.msra.mxu1 %v590_v13 }
  0x4c   : > { %623 = vmatpush1.msra.mxu0 %v578_v30  ;;  %745 = vmatprep.subr.mxu1 %v589_v16 }
  0x4d   : > { %624 = vmatprep.subr.mxu0 %v577_v31  ;;  %746 = vmatpush1.msra.mxu1 %v588_v17 }
  0x4e   : > { %625 = vmatpush1.msra.mxu0 %v576_v32  ;;  %747 = vmatprep.subr.mxu1 %v587_v20 }
  0x4f   : > { %626 = vmatprep.subr.mxu0 %v575_v33  ;;  %748 = vmatpush1.msra.mxu1 %v586_v21 }
  0x50   : > { %627 = vmatpush1.msra.mxu0 %v574_v34  ;;  %749 = vmatprep.subr.mxu1 %v585_v22 }
  0x51   : > { %628 = vmatprep.subr.mxu0 %v573_v35  ;;  %750 = vmatpush1.msra.mxu1 %v584_v23 }
  0x52   : > { %629 = vmatpush1.msra.mxu0 %v572_v36  ;;  %751 = vmatprep.subr.mxu1 %v583_v25 }
  0x53   : > { %630 = vmatprep.subr.mxu0 %v571_v37  ;;  %752 = vmatpush1.msra.mxu1 %v582_v26 }
  0x54   : > { %631 = vmatpush1.msra.mxu0 %v570_v38  ;;  %799 = vmatprep.mubr.f32.mxu1 %v955_v5 }
  0x55   : > { %632 = vmatprep.subr.mxu0 %v569_v39  ;;  %753 = vmatprep.subr.mxu1 %v581_v27 }
  0x56   : > { %633 = vmatpush1.msra.mxu0 %v568_v40  ;;  %754 = vmatpush1.msra.mxu1 %v580_v28 }
  0x57   : > { %667 = vmatmul.mubr.f32.vlgmr.msra.gmra.mxu0 %v1355_v41  ;;  %755 = vmatprep.subr.mxu1 %v579_v29 }
  0x58   : > { %756 = vmatpush1.msra.mxu1 %v578_v30 }
  0x59   : > { %757 = vmatprep.subr.mxu1 %v577_v31 }
  0x5a   : > { %758 = vmatpush1.msra.mxu1 %v576_v32 }
  0x5b   : > { %759 = vmatprep.subr.mxu1 %v575_v33 }
  0x5c   : > { %760 = vmatpush1.msra.mxu1 %v574_v34 }
  0x5d   : > { %761 = vmatprep.subr.mxu1 %v573_v35 }
  0x5e   : > { %762 = vmatpush1.msra.mxu1 %v572_v36 }
  0x5f   : > { %763 = vmatprep.subr.mxu1 %v571_v37 }
  0x60   : > { %764 = vmatpush1.msra.mxu1 %v570_v38 }
  0x61   : > { %765 = vmatprep.subr.mxu1 %v569_v39 }
  0x62   : > { %766 = vmatpush1.msra.mxu1 %v568_v40 }
  0xf7   : > { %v432_v44 = vpop.f32.mrf.mxu0 }
  0xf8   : > { %v433_v57 = vadd.f32 %v432_v44, %v359_v49 }
  0xf9   : > { %v434_v48 = vpop.f32.mrf.mxu0 }
  0xfa   : > { %v435_v2 = vadd.f32 %v434_v48, %v363_v51 }
  0xfd   : > { %v438_v50 = vpop.f32.mrf.mxu0 }
  0xfe   : > { %v439_v52 = vadd.f32 %v438_v50, %v359_v49  ;;  %v549_v55 = vpop.f32.mrf.mxu1 }
  0xff   : > { %v440_v53 = vpop.f32.mrf.mxu0 }
 0x100   : > { %v441_v54 = vadd.f32 %v440_v53, %v363_v51  ;;  %v551_v56 = vpop.f32.mrf.mxu1 }
 0x102   : > { %v555_v60 = vpop.f32.mrf.mxu1 }
 0x104   : > { %v557_v7 = vpop.f32.mrf.mxu1 }
 0x117   : > { %v668_v58 = vpop.f32.mrf.mxu0 }
 0x118   : > { %v669_v59 = vadd.f32 %v668_v58, %v433_v57 }
 0x119   : > { %v670_v1 = vpop.f32.mrf.mxu0 }
 0x11a   : > { %v675_v61 = vadd.f32 %v669_v59, %v555_v60  ;;  %v671_v3 = vadd.f32 %v670_v1, %v435_v2 }
 0x11c   : > { %v911_v62 = vmul.f32 -1.442695, %v675_v61  ;;  %v676_v8 = vadd.f32 %v671_v3, %v557_v7 }
 0x11e   : > { %938 = vpow2.f32 %v911_v62  ;;  %v690_v12 = vadd.f32 %v689_v9, %v676_v8 }
 0x120   : > { %v816_v28 = vmul.f32 %v912_v6, %v690_v12 }
 0x12b   : > { %v939_v63 = vpop.eup %938 }
 0x12c   : > { %v680_v0 = vadd.f32 1.0, %v939_v63 }
 0x12e   : > { %940 = vrcp.f32 %v680_v0 }
 0x13b   : > { %v941_v10 = vpop.eup %940 }
 0x13c   : > { %v692_v13 = vsub.f32 1.0, %v941_v10  ;;  %v691_v14 = vmul.f32 %v941_v10, %v565_v11 }
 0x13e   : > { %v693_v15 = vmul.f32 %v692_v13, %v690_v12 }
 0x140   : > { %v694_v16 = vadd.f32 %v693_v15, %v691_v14 }
 0x142   : > { %v695_v17 = vsub.f32 %v694_v16, %v1355_v41 }
 0x144   : > { %vm696_vm0 = vcmp.ge.f32.partialorder %v695_v17, 1.0 }
 0x145   : > { %v913_v18 = vsel %vm696_vm0, 1.0, %v955_v5  ;;  %914 = vmatmul.mubr.msk.f32.vlgmr.msra.gmra.mxu1 %vm696_vm0, %v956_v19 }
 0x146   : > { %v699_v20 = vpack.c.bf16 %v913_v18, %v913_v18 }
 0x148   : > { %700 = vst [vmem:[%s1018_s16] sm:$0xf] %v699_v20 }
 0x205   : > { %v801_v21 = vpop.f32.mrf.mxu1 }
 0x206   : > { %v802_v22 = vadd.f32 %v801_v21, %v439_v52 }
 0x207   : > { %v803_v23 = vpop.f32.mrf.mxu1 }
 0x208   : > { %v808_v24 = vadd.f32 %v802_v22, %v549_v55  ;;  %v804_v25 = vadd.f32 %v803_v23, %v441_v54 }
 0x20a   : > { %v915_v26 = vmul.f32 -1.442695, %v808_v24  ;;  %v809_v27 = vadd.f32 %v804_v25, %v551_v56 }
 0x20c   : > { %942 = vpow2.f32 %v915_v26  ;;  %v817_v29 = vadd.f32 %v816_v28, %v809_v27 }
 0x20e   : > { %830 = vst [vmem:[#allocation4] sm:$0xff] %v817_v29 }
 0x219   : > { %v943_v30 = vpop.eup %942 }
 0x21a   : > { %v813_v31 = vadd.f32 1.0, %v943_v30 }
 0x21c   : > { %944 = vrcp.f32 %v813_v31 }
 0x229   : > { %v945_v32 = vpop.eup %944 }
 0x22a   : > { %v819_v33 = vsub.f32 1.0, %v945_v32  ;;  %v818_v34 = vmul.f32 %v945_v32, %v695_v17 }
 0x22c   : > { %v820_v35 = vmul.f32 %v819_v33, %v817_v29 }
 0x22e   : > { %v821_v36 = vadd.f32 %v820_v35, %v818_v34 }
 0x230   : > { %v822_v37 = vsub.f32 %v821_v36, %v913_v18 }
 0x232   : > { %vm823_vm1 = vcmp.ge.f32.partialorder %v822_v37, 1.0  ;;  %829 = vst [vmem:[#allocation3] sm:$0xff] %v822_v37 }
 0x233   : > { %v916_v38 = vsel %vm823_vm1, 1.0, %v955_v5 }
 0x234   : > { %v826_v39 = vpack.c.bf16 %v916_v38, %v916_v38  ;;  %828 = vst [vmem:[#allocation2] sm:$0xff] %v916_v38 }
 0x236   : > { %827 = vst [vmem:[%s1018_s16 + $0x4] sm:$0xf] %v826_v39 }
 0x237 PF: > { %s17_s24 = sadd.s32 1, %s952_s24  }
 0x238   : > { %p14_p6 = scmp.ge.s32.totalorder %s17_s24, 6  }
 0x23a   :  { %16 = sbr.rel (!%p14_p6) target bundleno = 1 (0x1), region = 85 }

</bundles_post_ra>
